<compile_context>
chip_gen: v7x
topology: tpu7x:2x2x1
jax: 0.10.0
libtpu: 0.0.40
codegen_flags: <defaults>
</compile_context>

<pallas_src>
import jax
import jax.numpy as jnp
from jax import lax
from jax.experimental import pallas as pl
from jax.experimental.pallas import tpu as pltpu


def signal_encoder_kernel(x_ref, w1_ref, b1_ref, w2_ref, b2_ref, out_ref):
    """One block of B signals per grid step, channels-first (NCL).

    x_ref  : (B, Cin, L)      f32   NCL input block
    w1_ref : (C1, 3*Cin)      f32   conv1 weights, cols ordered (tap, in_ch)
    b1_ref : (C1, 1)          f32
    w2_ref : (Cout, 3*C1)     f32   conv2 weights, cols ordered (tap, in_ch)
    b2_ref : (Cout, 1)        f32
    out_ref: (B, Cout, L//4)  f32   NCL output block
    """
    B, Cin, L = x_ref.shape
    C1 = w1_ref.shape[0]
    Cout = w2_ref.shape[0]
    L2 = L // 2
    f32 = jnp.float32

    w1, bias1 = w1_ref[...], b1_ref[...]
    w2, bias2 = w2_ref[...], b2_ref[...]

    # 0/1 matrices that keep every even lane: sel[l, j] = (l == 2*j).
    def even_sel(n):
        row = lax.broadcasted_iota(jnp.int32, (n, n // 2), 0)
        col = lax.broadcasted_iota(jnp.int32, (n, n // 2), 1)
        return jnp.where(row == 2 * col, 1.0, 0.0)

    sel1 = even_sel(L)    # (L,  L/2)
    sel2 = even_sel(L2)   # (L/2, L/4)

    z_in = jnp.zeros((Cin, 1), f32)
    z_c1 = jnp.zeros((C1, 1), f32)
    z_co = jnp.zeros((Cout, 1), f32)

    def conv_relu(h, z, w, bias):
        """Conv1d(k=3, pad=1) as one im2col matmul; taps shifted along lanes."""
        h_m1 = jnp.concatenate([z, h[:, :-1]], axis=1)    # h[:, l-1], zero @ l=0
        h_p1 = jnp.concatenate([h[:, 1:], z], axis=1)     # h[:, l+1], zero @ end
        h3 = jnp.concatenate([h_m1, h, h_p1], axis=0)     # (3*C, L)
        y = jnp.dot(w, h3, preferred_element_type=f32) + bias
        return jnp.maximum(y, 0.0)

    def maxpool2(h, z, sel):
        """MaxPool1d(2): pairwise max, then keep even lanes (selection matmul)."""
        h_nxt = jnp.concatenate([h[:, 1:], z], axis=1)    # h[:, l+1]
        return jnp.dot(jnp.maximum(h, h_nxt), sel, preferred_element_type=f32)

    for b in range(B):                     # static unroll over the batch block
        x = x_ref[b]                                       # (Cin, L)
        h = conv_relu(x, z_in, w1, bias1)                  # (C1, L)
        h = maxpool2(h, z_c1, sel1)                        # (C1, L/2)
        y = conv_relu(h, z_c1, w2, bias2)                  # (Cout, L/2)
        y = maxpool2(y, z_co, sel2)                        # (Cout, L/4)
        out_ref[b] = y


def signal_encoder(x_ncl, w1_oik, b1, w2_oik, b2, *, max_block=8):
    """Forward pass. x_ncl: (N, Cin, L) PyTorch layout; weights (out, in, k=3).

    Returns (N, Cout, L//4) float32 in PyTorch NCL layout (no wrapper transposes).
    """
    N, Cin, L = x_ncl.shape
    C1, _, K1 = w1_oik.shape
    Cout, _, K2 = w2_oik.shape
    assert K1 == 3 and K2 == 3, "kernel_size=3 expected"
    assert L % 4 == 0, "length must be divisible by 4 (two MaxPool1d(2) stages)"
    L4 = L // 4
    f32 = jnp.float32

    # B signals per grid step: largest divisor of N <= max_block.  For real
    # workloads pick max_block so the grid keeps >= 8 steps (>= 4 per core on
    # v7x), letting the pipeline hide the HBM DMA behind compute.
    B = min(N, max_block)
    while N % B:
        B -= 1

    # Flatten weights so one matmul covers all 3 taps:
    #   Wf[co, k*Cin + ci] = w_torch[co, ci, k]   (tap k=0 pairs with x[l-1]).
    w1f = jnp.transpose(w1_oik, (0, 2, 1)).reshape(C1, 3 * Cin).astype(f32)
    w2f = jnp.transpose(w2_oik, (0, 2, 1)).reshape(Cout, 3 * C1).astype(f32)
    b1c = b1.reshape(C1, 1).astype(f32)
    b2c = b2.reshape(Cout, 1).astype(f32)

    return pl.pallas_call(
        signal_encoder_kernel,
        out_shape=jax.ShapeDtypeStruct((N, Cout, L4), f32),
        grid=(N // B,),
        in_specs=[
            pl.BlockSpec((B, Cin, L), lambda n: (n, 0, 0)),     # B signals, NCL
            pl.BlockSpec((C1, 3 * Cin), lambda n: (0, 0)),      # conv1 weights
            pl.BlockSpec((C1, 1), lambda n: (0, 0)),            # conv1 bias
            pl.BlockSpec((Cout, 3 * C1), lambda n: (0, 0)),     # conv2 weights
            pl.BlockSpec((Cout, 1), lambda n: (0, 0)),          # conv2 bias
        ],
        out_specs=pl.BlockSpec((B, Cout, L4), lambda n: (n, 0, 0)),  # NCL output
        compiler_params=pltpu.CompilerParams(
            dimension_semantics=("parallel",),       # megacore split on v7x
            vmem_limit_bytes=32 * 1024 * 1024,       # tiny blocks; v7x-safe
        ),
    )(x_ncl.astype(f32), w1f, b1c, w2f, b2c)


def reference_signal_encoder(x, w1_oik, b1, w2_oik, b2):
    """Pure-JAX f32 reference with PyTorch Conv1d/MaxPool1d semantics."""
    dn = ('NCH', 'OIH', 'NCH')
    y = lax.conv_general_dilated(x, w1_oik, (1,), [(1, 1)], dimension_numbers=dn)
    y = jnp.maximum(y + b1[None, :, None], 0.0)
    y = lax.reduce_window(y, -jnp.inf, lax.max, (1, 1, 2), (1, 1, 2), 'VALID')
    y = lax.conv_general_dilated(y, w2_oik, (1,), [(1, 1)], dimension_numbers=dn)
    y = jnp.maximum(y + b2[None, :, None], 0.0)
    y = lax.reduce_window(y, -jnp.inf, lax.max, (1, 1, 2), (1, 1, 2), 'VALID')
    return y


if __name__ == "__main__":
    # Small deterministic synthetic setup (no checkpoint loading).
    N, Cin, L = 16, 4, 64         # batch, input_channels, signal length
    C1 = 16                       # hidden conv channels (fixed by the module)
    Cout = 32                     # output_dim

    key = jax.random.PRNGKey(0)
    kx, kw1, kb1, kw2, kb2 = jax.random.split(key, 5)

    x = jax.random.normal(kx, (N, Cin, L), dtype=jnp.float32)
    # Parameters in PyTorch Conv1d layout (out_ch, in_ch, kernel).
    w1 = 0.1 * jax.random.normal(kw1, (C1, Cin, 3), dtype=jnp.float32)
    b1 = 0.1 * jax.random.normal(kb1, (C1,), dtype=jnp.float32)
    w2 = 0.1 * jax.random.normal(kw2, (Cout, C1, 3), dtype=jnp.float32)
    b2 = 0.1 * jax.random.normal(kb2, (Cout,), dtype=jnp.float32)

    encoder = jax.jit(signal_encoder)
    out = jax.block_until_ready(encoder(x, w1, b1, w2, b2))

    ref = reference_signal_encoder(x, w1, b1, w2, b2)
    assert out.shape == (N, Cout, L // 4), out.shape
    # f32 end-to-end; small slack for MXU pass-splitting vs. XLA's conv path.
    assert jnp.allclose(out, ref, atol=5e-3, rtol=5e-3), \
        float(jnp.max(jnp.abs(out - ref)))

    print("KERNEL_OK")
</pallas_src>

<mosaic_0001>
module attributes {stable_mosaic.version = 11 : i64} {
  func.func @signal_encoder_kernel(%arg0: i32, %arg1: memref<8x4x64xf32, #tpu.memory_space<vmem>>, %arg2: memref<16x12xf32, #tpu.memory_space<vmem>>, %arg3: memref<16x1xf32, #tpu.memory_space<vmem>>, %arg4: memref<32x48xf32, #tpu.memory_space<vmem>>, %arg5: memref<32x1xf32, #tpu.memory_space<vmem>>, %arg6: memref<8x32x16xf32, #tpu.memory_space<vmem>>) attributes {dimension_semantics = [#tpu.dimension_semantics<parallel>], iteration_bounds = array<i64: 2>, scalar_prefetch = 0 : i64, scratch_operands = 0 : i64, tpu.core_type = #tpu.core_type<tc>, window_params = [{transform_indices = @transform_0, window_bounds = array<i64: 8, 4, 64>}, {pipeline_mode = #tpu.pipeline_mode<synchronous>, transform_indices = @transform_1, window_bounds = array<i64: 16, 12>}, {pipeline_mode = #tpu.pipeline_mode<synchronous>, transform_indices = @transform_2, window_bounds = array<i64: 16, 1>}, {pipeline_mode = #tpu.pipeline_mode<synchronous>, transform_indices = @transform_3, window_bounds = array<i64: 32, 48>}, {pipeline_mode = #tpu.pipeline_mode<synchronous>, transform_indices = @transform_4, window_bounds = array<i64: 32, 1>}, {transform_indices = @transform_5, window_bounds = array<i64: 8, 32, 16>}]} {
    %c0 = arith.constant 0 : index
    %c0_0 = arith.constant 0 : index
    %0 = vector.load %arg2[%c0, %c0_0] : memref<16x12xf32, #tpu.memory_space<vmem>>, vector<16x12xf32>
    %c0_1 = arith.constant 0 : index
    %c0_2 = arith.constant 0 : index
    %1 = vector.load %arg3[%c0_1, %c0_2] : memref<16x1xf32, #tpu.memory_space<vmem>>, vector<16x1xf32>
    %c0_3 = arith.constant 0 : index
    %c0_4 = arith.constant 0 : index
    %2 = vector.load %arg4[%c0_3, %c0_4] : memref<32x48xf32, #tpu.memory_space<vmem>>, vector<32x48xf32>
    %c0_5 = arith.constant 0 : index
    %c0_6 = arith.constant 0 : index
    %3 = vector.load %arg5[%c0_5, %c0_6] : memref<32x1xf32, #tpu.memory_space<vmem>>, vector<32x1xf32>
    %4 = tpu.iota {dimensions = array<i32: 0>} : vector<64x32xi32>
    %5 = tpu.iota {dimensions = array<i32: 1>} : vector<64x32xi32>
    %c2_i32 = arith.constant 2 : i32
    %6 = vector.broadcast %c2_i32 : i32 to vector<64x32xi32>
    %7 = arith.muli %6, %5 : vector<64x32xi32>
    %8 = arith.cmpi eq, %4, %7 : vector<64x32xi32>
    %cst = arith.constant 1.000000e+00 : f32
    %cst_7 = arith.constant 0.000000e+00 : f32
    %9 = vector.broadcast %cst : f32 to vector<64x32xf32>
    %10 = vector.broadcast %cst_7 : f32 to vector<64x32xf32>
    %11 = arith.select %8, %9, %10 : vector<64x32xi1>, vector<64x32xf32>
    %12 = tpu.iota {dimensions = array<i32: 0>} : vector<32x16xi32>
    %13 = tpu.iota {dimensions = array<i32: 1>} : vector<32x16xi32>
    %c2_i32_8 = arith.constant 2 : i32
    %14 = vector.broadcast %c2_i32_8 : i32 to vector<32x16xi32>
    %15 = arith.muli %14, %13 : vector<32x16xi32>
    %16 = arith.cmpi eq, %12, %15 : vector<32x16xi32>
    %cst_9 = arith.constant 1.000000e+00 : f32
    %cst_10 = arith.constant 0.000000e+00 : f32
    %17 = vector.broadcast %cst_9 : f32 to vector<32x16xf32>
    %18 = vector.broadcast %cst_10 : f32 to vector<32x16xf32>
    %19 = arith.select %16, %17, %18 : vector<32x16xi1>, vector<32x16xf32>
    %cst_11 = arith.constant 0.000000e+00 : f32
    %20 = vector.broadcast %cst_11 : f32 to vector<4x1xf32>
    %cst_12 = arith.constant 0.000000e+00 : f32
    %21 = vector.broadcast %cst_12 : f32 to vector<16x1xf32>
    %cst_13 = arith.constant 0.000000e+00 : f32
    %22 = vector.broadcast %cst_13 : f32 to vector<32x1xf32>
    %c0_14 = arith.constant 0 : index
    %c0_15 = arith.constant 0 : index
    %c0_16 = arith.constant 0 : index
    %23 = vector.load %arg1[%c0_14, %c0_15, %c0_16] : memref<8x4x64xf32, #tpu.memory_space<vmem>>, vector<1x4x64xf32>
    %24 = vector.shape_cast %23 : vector<1x4x64xf32> to vector<4x64xf32>
    %25 = vector.extract_strided_slice %24 {offsets = [0, 0], sizes = [4, 63], strides = [1, 1]} : vector<4x64xf32> to vector<4x63xf32>
    %26 = tpu.concatenate %20, %25 in 1 : vector<4x1xf32>, vector<4x63xf32> -> vector<4x64xf32>
    %27 = vector.extract_strided_slice %24 {offsets = [0, 1], sizes = [4, 63], strides = [1, 1]} : vector<4x64xf32> to vector<4x63xf32>
    %28 = tpu.concatenate %27, %20 in 1 : vector<4x63xf32>, vector<4x1xf32> -> vector<4x64xf32>
    %29 = tpu.concatenate %26, %24, %28 in 0 : vector<4x64xf32>, vector<4x64xf32>, vector<4x64xf32> -> vector<12x64xf32>
    %cst_17 = arith.constant dense<0.000000e+00> : vector<16x64xf32>
    %30 = tpu.matmul %0, %29, %cst_17 {dimension_numbers = #tpu.dot_dimension_numbers<[1], [0], [0], [1], [0, 0, 1, 1], [], []>} : vector<16x12xf32>, vector<12x64xf32>, vector<16x64xf32> -> vector<16x64xf32>
    %31 = vector.broadcast %1 : vector<16x1xf32> to vector<16x64xf32>
    %32 = arith.addf %30, %31 : vector<16x64xf32>
    %cst_18 = arith.constant 0.000000e+00 : f32
    %33 = vector.broadcast %cst_18 : f32 to vector<16x64xf32>
    %34 = arith.maximumf %32, %33 : vector<16x64xf32>
    %35 = vector.extract_strided_slice %34 {offsets = [0, 1], sizes = [16, 63], strides = [1, 1]} : vector<16x64xf32> to vector<16x63xf32>
    %36 = tpu.concatenate %35, %21 in 1 : vector<16x63xf32>, vector<16x1xf32> -> vector<16x64xf32>
    %37 = arith.maximumf %34, %36 : vector<16x64xf32>
    %cst_19 = arith.constant dense<0.000000e+00> : vector<16x32xf32>
    %38 = tpu.matmul %37, %11, %cst_19 {dimension_numbers = #tpu.dot_dimension_numbers<[1], [0], [0], [1], [0, 0, 1, 1], [], []>} : vector<16x64xf32>, vector<64x32xf32>, vector<16x32xf32> -> vector<16x32xf32>
    %39 = vector.extract_strided_slice %38 {offsets = [0, 0], sizes = [16, 31], strides = [1, 1]} : vector<16x32xf32> to vector<16x31xf32>
    %40 = tpu.concatenate %21, %39 in 1 : vector<16x1xf32>, vector<16x31xf32> -> vector<16x32xf32>
    %41 = vector.extract_strided_slice %38 {offsets = [0, 1], sizes = [16, 31], strides = [1, 1]} : vector<16x32xf32> to vector<16x31xf32>
    %42 = tpu.concatenate %41, %21 in 1 : vector<16x31xf32>, vector<16x1xf32> -> vector<16x32xf32>
    %43 = tpu.concatenate %40, %38, %42 in 0 : vector<16x32xf32>, vector<16x32xf32>, vector<16x32xf32> -> vector<48x32xf32>
    %cst_20 = arith.constant dense<0.000000e+00> : vector<32x32xf32>
    %44 = tpu.matmul %2, %43, %cst_20 {dimension_numbers = #tpu.dot_dimension_numbers<[1], [0], [0], [1], [0, 0, 1, 1], [], []>} : vector<32x48xf32>, vector<48x32xf32>, vector<32x32xf32> -> vector<32x32xf32>
    %45 = vector.broadcast %3 : vector<32x1xf32> to vector<32x32xf32>
    %46 = arith.addf %44, %45 : vector<32x32xf32>
    %cst_21 = arith.constant 0.000000e+00 : f32
    %47 = vector.broadcast %cst_21 : f32 to vector<32x32xf32>
    %48 = arith.maximumf %46, %47 : vector<32x32xf32>
    %49 = vector.extract_strided_slice %48 {offsets = [0, 1], sizes = [32, 31], strides = [1, 1]} : vector<32x32xf32> to vector<32x31xf32>
    %50 = tpu.concatenate %49, %22 in 1 : vector<32x31xf32>, vector<32x1xf32> -> vector<32x32xf32>
    %51 = arith.maximumf %48, %50 : vector<32x32xf32>
    %cst_22 = arith.constant dense<0.000000e+00> : vector<32x16xf32>
    %52 = tpu.matmul %51, %19, %cst_22 {dimension_numbers = #tpu.dot_dimension_numbers<[1], [0], [0], [1], [0, 0, 1, 1], [], []>} : vector<32x32xf32>, vector<32x16xf32>, vector<32x16xf32> -> vector<32x16xf32>
    %c0_23 = arith.constant 0 : index
    %c0_24 = arith.constant 0 : index
    %c0_25 = arith.constant 0 : index
    %53 = vector.load %arg6[%c0_23, %c0_24, %c0_25] : memref<8x32x16xf32, #tpu.memory_space<vmem>>, vector<1x32x16xf32>
    %54 = vector.shape_cast %53 : vector<1x32x16xf32> to vector<32x16xf32>
    %55 = vector.shape_cast %52 : vector<32x16xf32> to vector<1x32x16xf32>
    tpu.vector_store %arg6[%c0_23, %c0_24, %c0_25], %55 {strides = array<i32>} : memref<8x32x16xf32, #tpu.memory_space<vmem>>, vector<1x32x16xf32>,
    %c1 = arith.constant 1 : index
    %c0_26 = arith.constant 0 : index
    %c0_27 = arith.constant 0 : index
    %56 = vector.load %arg1[%c1, %c0_26, %c0_27] : memref<8x4x64xf32, #tpu.memory_space<vmem>>, vector<1x4x64xf32>
    %57 = vector.shape_cast %56 : vector<1x4x64xf32> to vector<4x64xf32>
    %58 = vector.extract_strided_slice %57 {offsets = [0, 0], sizes = [4, 63], strides = [1, 1]} : vector<4x64xf32> to vector<4x63xf32>
    %59 = tpu.concatenate %20, %58 in 1 : vector<4x1xf32>, vector<4x63xf32> -> vector<4x64xf32>
    %60 = vector.extract_strided_slice %57 {offsets = [0, 1], sizes = [4, 63], strides = [1, 1]} : vector<4x64xf32> to vector<4x63xf32>
    %61 = tpu.concatenate %60, %20 in 1 : vector<4x63xf32>, vector<4x1xf32> -> vector<4x64xf32>
    %62 = tpu.concatenate %59, %57, %61 in 0 : vector<4x64xf32>, vector<4x64xf32>, vector<4x64xf32> -> vector<12x64xf32>
    %cst_28 = arith.constant dense<0.000000e+00> : vector<16x64xf32>
    %63 = tpu.matmul %0, %62, %cst_28 {dimension_numbers = #tpu.dot_dimension_numbers<[1], [0], [0], [1], [0, 0, 1, 1], [], []>} : vector<16x12xf32>, vector<12x64xf32>, vector<16x64xf32> -> vector<16x64xf32>
    %64 = vector.broadcast %1 : vector<16x1xf32> to vector<16x64xf32>
    %65 = arith.addf %63, %64 : vector<16x64xf32>
    %cst_29 = arith.constant 0.000000e+00 : f32
    %66 = vector.broadcast %cst_29 : f32 to vector<16x64xf32>
    %67 = arith.maximumf %65, %66 : vector<16x64xf32>
    %68 = vector.extract_strided_slice %67 {offsets = [0, 1], sizes = [16, 63], strides = [1, 1]} : vector<16x64xf32> to vector<16x63xf32>
    %69 = tpu.concatenate %68, %21 in 1 : vector<16x63xf32>, vector<16x1xf32> -> vector<16x64xf32>
    %70 = arith.maximumf %67, %69 : vector<16x64xf32>
    %cst_30 = arith.constant dense<0.000000e+00> : vector<16x32xf32>
    %71 = tpu.matmul %70, %11, %cst_30 {dimension_numbers = #tpu.dot_dimension_numbers<[1], [0], [0], [1], [0, 0, 1, 1], [], []>} : vector<16x64xf32>, vector<64x32xf32>, vector<16x32xf32> -> vector<16x32xf32>
    %72 = vector.extract_strided_slice %71 {offsets = [0, 0], sizes = [16, 31], strides = [1, 1]} : vector<16x32xf32> to vector<16x31xf32>
    %73 = tpu.concatenate %21, %72 in 1 : vector<16x1xf32>, vector<16x31xf32> -> vector<16x32xf32>
    %74 = vector.extract_strided_slice %71 {offsets = [0, 1], sizes = [16, 31], strides = [1, 1]} : vector<16x32xf32> to vector<16x31xf32>
    %75 = tpu.concatenate %74, %21 in 1 : vector<16x31xf32>, vector<16x1xf32> -> vector<16x32xf32>
    %76 = tpu.concatenate %73, %71, %75 in 0 : vector<16x32xf32>, vector<16x32xf32>, vector<16x32xf32> -> vector<48x32xf32>
    %cst_31 = arith.constant dense<0.000000e+00> : vector<32x32xf32>
    %77 = tpu.matmul %2, %76, %cst_31 {dimension_numbers = #tpu.dot_dimension_numbers<[1], [0], [0], [1], [0, 0, 1, 1], [], []>} : vector<32x48xf32>, vector<48x32xf32>, vector<32x32xf32> -> vector<32x32xf32>
    %78 = vector.broadcast %3 : vector<32x1xf32> to vector<32x32xf32>
    %79 = arith.addf %77, %78 : vector<32x32xf32>
    %cst_32 = arith.constant 0.000000e+00 : f32
    %80 = vector.broadcast %cst_32 : f32 to vector<32x32xf32>
    %81 = arith.maximumf %79, %80 : vector<32x32xf32>
    %82 = vector.extract_strided_slice %81 {offsets = [0, 1], sizes = [32, 31], strides = [1, 1]} : vector<32x32xf32> to vector<32x31xf32>
    %83 = tpu.concatenate %82, %22 in 1 : vector<32x31xf32>, vector<32x1xf32> -> vector<32x32xf32>
    %84 = arith.maximumf %81, %83 : vector<32x32xf32>
    %cst_33 = arith.constant dense<0.000000e+00> : vector<32x16xf32>
    %85 = tpu.matmul %84, %19, %cst_33 {dimension_numbers = #tpu.dot_dimension_numbers<[1], [0], [0], [1], [0, 0, 1, 1], [], []>} : vector<32x32xf32>, vector<32x16xf32>, vector<32x16xf32> -> vector<32x16xf32>
    %c1_34 = arith.constant 1 : index
    %c0_35 = arith.constant 0 : index
    %c0_36 = arith.constant 0 : index
    %86 = vector.load %arg6[%c1_34, %c0_35, %c0_36] : memref<8x32x16xf32, #tpu.memory_space<vmem>>, vector<1x32x16xf32>
    %87 = vector.shape_cast %86 : vector<1x32x16xf32> to vector<32x16xf32>
    %88 = vector.shape_cast %85 : vector<32x16xf32> to vector<1x32x16xf32>
    tpu.vector_store %arg6[%c1_34, %c0_35, %c0_36], %88 {strides = array<i32>} : memref<8x32x16xf32, #tpu.memory_space<vmem>>, vector<1x32x16xf32>,
    %c2 = arith.constant 2 : index
    %c0_37 = arith.constant 0 : index
    %c0_38 = arith.constant 0 : index
    %89 = vector.load %arg1[%c2, %c0_37, %c0_38] : memref<8x4x64xf32, #tpu.memory_space<vmem>>, vector<1x4x64xf32>
    %90 = vector.shape_cast %89 : vector<1x4x64xf32> to vector<4x64xf32>
    %91 = vector.extract_strided_slice %90 {offsets = [0, 0], sizes = [4, 63], strides = [1, 1]} : vector<4x64xf32> to vector<4x63xf32>
    %92 = tpu.concatenate %20, %91 in 1 : vector<4x1xf32>, vector<4x63xf32> -> vector<4x64xf32>
    %93 = vector.extract_strided_slice %90 {offsets = [0, 1], sizes = [4, 63], strides = [1, 1]} : vector<4x64xf32> to vector<4x63xf32>
    %94 = tpu.concatenate %93, %20 in 1 : vector<4x63xf32>, vector<4x1xf32> -> vector<4x64xf32>
    %95 = tpu.concatenate %92, %90, %94 in 0 : vector<4x64xf32>, vector<4x64xf32>, vector<4x64xf32> -> vector<12x64xf32>
    %cst_39 = arith.constant dense<0.000000e+00> : vector<16x64xf32>
    %96 = tpu.matmul %0, %95, %cst_39 {dimension_numbers = #tpu.dot_dimension_numbers<[1], [0], [0], [1], [0, 0, 1, 1], [], []>} : vector<16x12xf32>, vector<12x64xf32>, vector<16x64xf32> -> vector<16x64xf32>
    %97 = vector.broadcast %1 : vector<16x1xf32> to vector<16x64xf32>
    %98 = arith.addf %96, %97 : vector<16x64xf32>
    %cst_40 = arith.constant 0.000000e+00 : f32
    %99 = vector.broadcast %cst_40 : f32 to vector<16x64xf32>
    %100 = arith.maximumf %98, %99 : vector<16x64xf32>
    %101 = vector.extract_strided_slice %100 {offsets = [0, 1], sizes = [16, 63], strides = [1, 1]} : vector<16x64xf32> to vector<16x63xf32>
    %102 = tpu.concatenate %101, %21 in 1 : vector<16x63xf32>, vector<16x1xf32> -> vector<16x64xf32>
    %103 = arith.maximumf %100, %102 : vector<16x64xf32>
    %cst_41 = arith.constant dense<0.000000e+00> : vector<16x32xf32>
    %104 = tpu.matmul %103, %11, %cst_41 {dimension_numbers = #tpu.dot_dimension_numbers<[1], [0], [0], [1], [0, 0, 1, 1], [], []>} : vector<16x64xf32>, vector<64x32xf32>, vector<16x32xf32> -> vector<16x32xf32>
    %105 = vector.extract_strided_slice %104 {offsets = [0, 0], sizes = [16, 31], strides = [1, 1]} : vector<16x32xf32> to vector<16x31xf32>
    %106 = tpu.concatenate %21, %105 in 1 : vector<16x1xf32>, vector<16x31xf32> -> vector<16x32xf32>
    %107 = vector.extract_strided_slice %104 {offsets = [0, 1], sizes = [16, 31], strides = [1, 1]} : vector<16x32xf32> to vector<16x31xf32>
    %108 = tpu.concatenate %107, %21 in 1 : vector<16x31xf32>, vector<16x1xf32> -> vector<16x32xf32>
    %109 = tpu.concatenate %106, %104, %108 in 0 : vector<16x32xf32>, vector<16x32xf32>, vector<16x32xf32> -> vector<48x32xf32>
    %cst_42 = arith.constant dense<0.000000e+00> : vector<32x32xf32>
    %110 = tpu.matmul %2, %109, %cst_42 {dimension_numbers = #tpu.dot_dimension_numbers<[1], [0], [0], [1], [0, 0, 1, 1], [], []>} : vector<32x48xf32>, vector<48x32xf32>, vector<32x32xf32> -> vector<32x32xf32>
    %111 = vector.broadcast %3 : vector<32x1xf32> to vector<32x32xf32>
    %112 = arith.addf %110, %111 : vector<32x32xf32>
    %cst_43 = arith.constant 0.000000e+00 : f32
    %113 = vector.broadcast %cst_43 : f32 to vector<32x32xf32>
    %114 = arith.maximumf %112, %113 : vector<32x32xf32>
    %115 = vector.extract_strided_slice %114 {offsets = [0, 1], sizes = [32, 31], strides = [1, 1]} : vector<32x32xf32> to vector<32x31xf32>
    %116 = tpu.concatenate %115, %22 in 1 : vector<32x31xf32>, vector<32x1xf32> -> vector<32x32xf32>
    %117 = arith.maximumf %114, %116 : vector<32x32xf32>
    %cst_44 = arith.constant dense<0.000000e+00> : vector<32x16xf32>
    %118 = tpu.matmul %117, %19, %cst_44 {dimension_numbers = #tpu.dot_dimension_numbers<[1], [0], [0], [1], [0, 0, 1, 1], [], []>} : vector<32x32xf32>, vector<32x16xf32>, vector<32x16xf32> -> vector<32x16xf32>
    %c2_45 = arith.constant 2 : index
    %c0_46 = arith.constant 0 : index
    %c0_47 = arith.constant 0 : index
    %119 = vector.load %arg6[%c2_45, %c0_46, %c0_47] : memref<8x32x16xf32, #tpu.memory_space<vmem>>, vector<1x32x16xf32>
    %120 = vector.shape_cast %119 : vector<1x32x16xf32> to vector<32x16xf32>
    %121 = vector.shape_cast %118 : vector<32x16xf32> to vector<1x32x16xf32>
    tpu.vector_store %arg6[%c2_45, %c0_46, %c0_47], %121 {strides = array<i32>} : memref<8x32x16xf32, #tpu.memory_space<vmem>>, vector<1x32x16xf32>,
    %c3 = arith.constant 3 : index
    %c0_48 = arith.constant 0 : index
    %c0_49 = arith.constant 0 : index
    %122 = vector.load %arg1[%c3, %c0_48, %c0_49] : memref<8x4x64xf32, #tpu.memory_space<vmem>>, vector<1x4x64xf32>
    %123 = vector.shape_cast %122 : vector<1x4x64xf32> to vector<4x64xf32>
    %124 = vector.extract_strided_slice %123 {offsets = [0, 0], sizes = [4, 63], strides = [1, 1]} : vector<4x64xf32> to vector<4x63xf32>
    %125 = tpu.concatenate %20, %124 in 1 : vector<4x1xf32>, vector<4x63xf32> -> vector<4x64xf32>
    %126 = vector.extract_strided_slice %123 {offsets = [0, 1], sizes = [4, 63], strides = [1, 1]} : vector<4x64xf32> to vector<4x63xf32>
    %127 = tpu.concatenate %126, %20 in 1 : vector<4x63xf32>, vector<4x1xf32> -> vector<4x64xf32>
    %128 = tpu.concatenate %125, %123, %127 in 0 : vector<4x64xf32>, vector<4x64xf32>, vector<4x64xf32> -> vector<12x64xf32>
    %cst_50 = arith.constant dense<0.000000e+00> : vector<16x64xf32>
    %129 = tpu.matmul %0, %128, %cst_50 {dimension_numbers = #tpu.dot_dimension_numbers<[1], [0], [0], [1], [0, 0, 1, 1], [], []>} : vector<16x12xf32>, vector<12x64xf32>, vector<16x64xf32> -> vector<16x64xf32>
    %130 = vector.broadcast %1 : vector<16x1xf32> to vector<16x64xf32>
    %131 = arith.addf %129, %130 : vector<16x64xf32>
    %cst_51 = arith.constant 0.000000e+00 : f32
    %132 = vector.broadcast %cst_51 : f32 to vector<16x64xf32>
    %133 = arith.maximumf %131, %132 : vector<16x64xf32>
    %134 = vector.extract_strided_slice %133 {offsets = [0, 1], sizes = [16, 63], strides = [1, 1]} : vector<16x64xf32> to vector<16x63xf32>
    %135 = tpu.concatenate %134, %21 in 1 : vector<16x63xf32>, vector<16x1xf32> -> vector<16x64xf32>
    %136 = arith.maximumf %133, %135 : vector<16x64xf32>
    %cst_52 = arith.constant dense<0.000000e+00> : vector<16x32xf32>
    %137 = tpu.matmul %136, %11, %cst_52 {dimension_numbers = #tpu.dot_dimension_numbers<[1], [0], [0], [1], [0, 0, 1, 1], [], []>} : vector<16x64xf32>, vector<64x32xf32>, vector<16x32xf32> -> vector<16x32xf32>
    %138 = vector.extract_strided_slice %137 {offsets = [0, 0], sizes = [16, 31], strides = [1, 1]} : vector<16x32xf32> to vector<16x31xf32>
    %139 = tpu.concatenate %21, %138 in 1 : vector<16x1xf32>, vector<16x31xf32> -> vector<16x32xf32>
    %140 = vector.extract_strided_slice %137 {offsets = [0, 1], sizes = [16, 31], strides = [1, 1]} : vector<16x32xf32> to vector<16x31xf32>
    %141 = tpu.concatenate %140, %21 in 1 : vector<16x31xf32>, vector<16x1xf32> -> vector<16x32xf32>
    %142 = tpu.concatenate %139, %137, %141 in 0 : vector<16x32xf32>, vector<16x32xf32>, vector<16x32xf32> -> vector<48x32xf32>
    %cst_53 = arith.constant dense<0.000000e+00> : vector<32x32xf32>
    %143 = tpu.matmul %2, %142, %cst_53 {dimension_numbers = #tpu.dot_dimension_numbers<[1], [0], [0], [1], [0, 0, 1, 1], [], []>} : vector<32x48xf32>, vector<48x32xf32>, vector<32x32xf32> -> vector<32x32xf32>
    %144 = vector.broadcast %3 : vector<32x1xf32> to vector<32x32xf32>
    %145 = arith.addf %143, %144 : vector<32x32xf32>
    %cst_54 = arith.constant 0.000000e+00 : f32
    %146 = vector.broadcast %cst_54 : f32 to vector<32x32xf32>
    %147 = arith.maximumf %145, %146 : vector<32x32xf32>
    %148 = vector.extract_strided_slice %147 {offsets = [0, 1], sizes = [32, 31], strides = [1, 1]} : vector<32x32xf32> to vector<32x31xf32>
    %149 = tpu.concatenate %148, %22 in 1 : vector<32x31xf32>, vector<32x1xf32> -> vector<32x32xf32>
    %150 = arith.maximumf %147, %149 : vector<32x32xf32>
    %cst_55 = arith.constant dense<0.000000e+00> : vector<32x16xf32>
    %151 = tpu.matmul %150, %19, %cst_55 {dimension_numbers = #tpu.dot_dimension_numbers<[1], [0], [0], [1], [0, 0, 1, 1], [], []>} : vector<32x32xf32>, vector<32x16xf32>, vector<32x16xf32> -> vector<32x16xf32>
    %c3_56 = arith.constant 3 : index
    %c0_57 = arith.constant 0 : index
    %c0_58 = arith.constant 0 : index
    %152 = vector.load %arg6[%c3_56, %c0_57, %c0_58] : memref<8x32x16xf32, #tpu.memory_space<vmem>>, vector<1x32x16xf32>
    %153 = vector.shape_cast %152 : vector<1x32x16xf32> to vector<32x16xf32>
    %154 = vector.shape_cast %151 : vector<32x16xf32> to vector<1x32x16xf32>
    tpu.vector_store %arg6[%c3_56, %c0_57, %c0_58], %154 {strides = array<i32>} : memref<8x32x16xf32, #tpu.memory_space<vmem>>, vector<1x32x16xf32>,
    %c4 = arith.constant 4 : index
    %c0_59 = arith.constant 0 : index
    %c0_60 = arith.constant 0 : index
    %155 = vector.load %arg1[%c4, %c0_59, %c0_60] : memref<8x4x64xf32, #tpu.memory_space<vmem>>, vector<1x4x64xf32>
    %156 = vector.shape_cast %155 : vector<1x4x64xf32> to vector<4x64xf32>
    %157 = vector.extract_strided_slice %156 {offsets = [0, 0], sizes = [4, 63], strides = [1, 1]} : vector<4x64xf32> to vector<4x63xf32>
    %158 = tpu.concatenate %20, %157 in 1 : vector<4x1xf32>, vector<4x63xf32> -> vector<4x64xf32>
    %159 = vector.extract_strided_slice %156 {offsets = [0, 1], sizes = [4, 63], strides = [1, 1]} : vector<4x64xf32> to vector<4x63xf32>
    %160 = tpu.concatenate %159, %20 in 1 : vector<4x63xf32>, vector<4x1xf32> -> vector<4x64xf32>
    %161 = tpu.concatenate %158, %156, %160 in 0 : vector<4x64xf32>, vector<4x64xf32>, vector<4x64xf32> -> vector<12x64xf32>
    %cst_61 = arith.constant dense<0.000000e+00> : vector<16x64xf32>
    %162 = tpu.matmul %0, %161, %cst_61 {dimension_numbers = #tpu.dot_dimension_numbers<[1], [0], [0], [1], [0, 0, 1, 1], [], []>} : vector<16x12xf32>, vector<12x64xf32>, vector<16x64xf32> -> vector<16x64xf32>
    %163 = vector.broadcast %1 : vector<16x1xf32> to vector<16x64xf32>
    %164 = arith.addf %162, %163 : vector<16x64xf32>
    %cst_62 = arith.constant 0.000000e+00 : f32
    %165 = vector.broadcast %cst_62 : f32 to vector<16x64xf32>
    %166 = arith.maximumf %164, %165 : vector<16x64xf32>
    %167 = vector.extract_strided_slice %166 {offsets = [0, 1], sizes = [16, 63], strides = [1, 1]} : vector<16x64xf32> to vector<16x63xf32>
    %168 = tpu.concatenate %167, %21 in 1 : vector<16x63xf32>, vector<16x1xf32> -> vector<16x64xf32>
    %169 = arith.maximumf %166, %168 : vector<16x64xf32>
    %cst_63 = arith.constant dense<0.000000e+00> : vector<16x32xf32>
    %170 = tpu.matmul %169, %11, %cst_63 {dimension_numbers = #tpu.dot_dimension_numbers<[1], [0], [0], [1], [0, 0, 1, 1], [], []>} : vector<16x64xf32>, vector<64x32xf32>, vector<16x32xf32> -> vector<16x32xf32>
    %171 = vector.extract_strided_slice %170 {offsets = [0, 0], sizes = [16, 31], strides = [1, 1]} : vector<16x32xf32> to vector<16x31xf32>
    %172 = tpu.concatenate %21, %171 in 1 : vector<16x1xf32>, vector<16x31xf32> -> vector<16x32xf32>
    %173 = vector.extract_strided_slice %170 {offsets = [0, 1], sizes = [16, 31], strides = [1, 1]} : vector<16x32xf32> to vector<16x31xf32>
    %174 = tpu.concatenate %173, %21 in 1 : vector<16x31xf32>, vector<16x1xf32> -> vector<16x32xf32>
    %175 = tpu.concatenate %172, %170, %174 in 0 : vector<16x32xf32>, vector<16x32xf32>, vector<16x32xf32> -> vector<48x32xf32>
    %cst_64 = arith.constant dense<0.000000e+00> : vector<32x32xf32>
    %176 = tpu.matmul %2, %175, %cst_64 {dimension_numbers = #tpu.dot_dimension_numbers<[1], [0], [0], [1], [0, 0, 1, 1], [], []>} : vector<32x48xf32>, vector<48x32xf32>, vector<32x32xf32> -> vector<32x32xf32>
    %177 = vector.broadcast %3 : vector<32x1xf32> to vector<32x32xf32>
    %178 = arith.addf %176, %177 : vector<32x32xf32>
    %cst_65 = arith.constant 0.000000e+00 : f32
    %179 = vector.broadcast %cst_65 : f32 to vector<32x32xf32>
    %180 = arith.maximumf %178, %179 : vector<32x32xf32>
    %181 = vector.extract_strided_slice %180 {offsets = [0, 1], sizes = [32, 31], strides = [1, 1]} : vector<32x32xf32> to vector<32x31xf32>
    %182 = tpu.concatenate %181, %22 in 1 : vector<32x31xf32>, vector<32x1xf32> -> vector<32x32xf32>
    %183 = arith.maximumf %180, %182 : vector<32x32xf32>
    %cst_66 = arith.constant dense<0.000000e+00> : vector<32x16xf32>
    %184 = tpu.matmul %183, %19, %cst_66 {dimension_numbers = #tpu.dot_dimension_numbers<[1], [0], [0], [1], [0, 0, 1, 1], [], []>} : vector<32x32xf32>, vector<32x16xf32>, vector<32x16xf32> -> vector<32x16xf32>
    %c4_67 = arith.constant 4 : index
    %c0_68 = arith.constant 0 : index
    %c0_69 = arith.constant 0 : index
    %185 = vector.load %arg6[%c4_67, %c0_68, %c0_69] : memref<8x32x16xf32, #tpu.memory_space<vmem>>, vector<1x32x16xf32>
    %186 = vector.shape_cast %185 : vector<1x32x16xf32> to vector<32x16xf32>
    %187 = vector.shape_cast %184 : vector<32x16xf32> to vector<1x32x16xf32>
    tpu.vector_store %arg6[%c4_67, %c0_68, %c0_69], %187 {strides = array<i32>} : memref<8x32x16xf32, #tpu.memory_space<vmem>>, vector<1x32x16xf32>,
    %c5 = arith.constant 5 : index
    %c0_70 = arith.constant 0 : index
    %c0_71 = arith.constant 0 : index
    %188 = vector.load %arg1[%c5, %c0_70, %c0_71] : memref<8x4x64xf32, #tpu.memory_space<vmem>>, vector<1x4x64xf32>
    %189 = vector.shape_cast %188 : vector<1x4x64xf32> to vector<4x64xf32>
    %190 = vector.extract_strided_slice %189 {offsets = [0, 0], sizes = [4, 63], strides = [1, 1]} : vector<4x64xf32> to vector<4x63xf32>
    %191 = tpu.concatenate %20, %190 in 1 : vector<4x1xf32>, vector<4x63xf32> -> vector<4x64xf32>
    %192 = vector.extract_strided_slice %189 {offsets = [0, 1], sizes = [4, 63], strides = [1, 1]} : vector<4x64xf32> to vector<4x63xf32>
    %193 = tpu.concatenate %192, %20 in 1 : vector<4x63xf32>, vector<4x1xf32> -> vector<4x64xf32>
    %194 = tpu.concatenate %191, %189, %193 in 0 : vector<4x64xf32>, vector<4x64xf32>, vector<4x64xf32> -> vector<12x64xf32>
    %cst_72 = arith.constant dense<0.000000e+00> : vector<16x64xf32>
    %195 = tpu.matmul %0, %194, %cst_72 {dimension_numbers = #tpu.dot_dimension_numbers<[1], [0], [0], [1], [0, 0, 1, 1], [], []>} : vector<16x12xf32>, vector<12x64xf32>, vector<16x64xf32> -> vector<16x64xf32>
    %196 = vector.broadcast %1 : vector<16x1xf32> to vector<16x64xf32>
    %197 = arith.addf %195, %196 : vector<16x64xf32>
    %cst_73 = arith.constant 0.000000e+00 : f32
    %198 = vector.broadcast %cst_73 : f32 to vector<16x64xf32>
    %199 = arith.maximumf %197, %198 : vector<16x64xf32>
    %200 = vector.extract_strided_slice %199 {offsets = [0, 1], sizes = [16, 63], strides = [1, 1]} : vector<16x64xf32> to vector<16x63xf32>
    %201 = tpu.concatenate %200, %21 in 1 : vector<16x63xf32>, vector<16x1xf32> -> vector<16x64xf32>
    %202 = arith.maximumf %199, %201 : vector<16x64xf32>
    %cst_74 = arith.constant dense<0.000000e+00> : vector<16x32xf32>
    %203 = tpu.matmul %202, %11, %cst_74 {dimension_numbers = #tpu.dot_dimension_numbers<[1], [0], [0], [1], [0, 0, 1, 1], [], []>} : vector<16x64xf32>, vector<64x32xf32>, vector<16x32xf32> -> vector<16x32xf32>
    %204 = vector.extract_strided_slice %203 {offsets = [0, 0], sizes = [16, 31], strides = [1, 1]} : vector<16x32xf32> to vector<16x31xf32>
    %205 = tpu.concatenate %21, %204 in 1 : vector<16x1xf32>, vector<16x31xf32> -> vector<16x32xf32>
    %206 = vector.extract_strided_slice %203 {offsets = [0, 1], sizes = [16, 31], strides = [1, 1]} : vector<16x32xf32> to vector<16x31xf32>
    %207 = tpu.concatenate %206, %21 in 1 : vector<16x31xf32>, vector<16x1xf32> -> vector<16x32xf32>
    %208 = tpu.concatenate %205, %203, %207 in 0 : vector<16x32xf32>, vector<16x32xf32>, vector<16x32xf32> -> vector<48x32xf32>
    %cst_75 = arith.constant dense<0.000000e+00> : vector<32x32xf32>
    %209 = tpu.matmul %2, %208, %cst_75 {dimension_numbers = #tpu.dot_dimension_numbers<[1], [0], [0], [1], [0, 0, 1, 1], [], []>} : vector<32x48xf32>, vector<48x32xf32>, vector<32x32xf32> -> vector<32x32xf32>
    %210 = vector.broadcast %3 : vector<32x1xf32> to vector<32x32xf32>
    %211 = arith.addf %209, %210 : vector<32x32xf32>
    %cst_76 = arith.constant 0.000000e+00 : f32
    %212 = vector.broadcast %cst_76 : f32 to vector<32x32xf32>
    %213 = arith.maximumf %211, %212 : vector<32x32xf32>
    %214 = vector.extract_strided_slice %213 {offsets = [0, 1], sizes = [32, 31], strides = [1, 1]} : vector<32x32xf32> to vector<32x31xf32>
    %215 = tpu.concatenate %214, %22 in 1 : vector<32x31xf32>, vector<32x1xf32> -> vector<32x32xf32>
    %216 = arith.maximumf %213, %215 : vector<32x32xf32>
    %cst_77 = arith.constant dense<0.000000e+00> : vector<32x16xf32>
    %217 = tpu.matmul %216, %19, %cst_77 {dimension_numbers = #tpu.dot_dimension_numbers<[1], [0], [0], [1], [0, 0, 1, 1], [], []>} : vector<32x32xf32>, vector<32x16xf32>, vector<32x16xf32> -> vector<32x16xf32>
    %c5_78 = arith.constant 5 : index
    %c0_79 = arith.constant 0 : index
    %c0_80 = arith.constant 0 : index
    %218 = vector.load %arg6[%c5_78, %c0_79, %c0_80] : memref<8x32x16xf32, #tpu.memory_space<vmem>>, vector<1x32x16xf32>
    %219 = vector.shape_cast %218 : vector<1x32x16xf32> to vector<32x16xf32>
    %220 = vector.shape_cast %217 : vector<32x16xf32> to vector<1x32x16xf32>
    tpu.vector_store %arg6[%c5_78, %c0_79, %c0_80], %220 {strides = array<i32>} : memref<8x32x16xf32, #tpu.memory_space<vmem>>, vector<1x32x16xf32>,
    %c6 = arith.constant 6 : index
    %c0_81 = arith.constant 0 : index
    %c0_82 = arith.constant 0 : index
    %221 = vector.load %arg1[%c6, %c0_81, %c0_82] : memref<8x4x64xf32, #tpu.memory_space<vmem>>, vector<1x4x64xf32>
    %222 = vector.shape_cast %221 : vector<1x4x64xf32> to vector<4x64xf32>
    %223 = vector.extract_strided_slice %222 {offsets = [0, 0], sizes = [4, 63], strides = [1, 1]} : vector<4x64xf32> to vector<4x63xf32>
    %224 = tpu.concatenate %20, %223 in 1 : vector<4x1xf32>, vector<4x63xf32> -> vector<4x64xf32>
    %225 = vector.extract_strided_slice %222 {offsets = [0, 1], sizes = [4, 63], strides = [1, 1]} : vector<4x64xf32> to vector<4x63xf32>
    %226 = tpu.concatenate %225, %20 in 1 : vector<4x63xf32>, vector<4x1xf32> -> vector<4x64xf32>
    %227 = tpu.concatenate %224, %222, %226 in 0 : vector<4x64xf32>, vector<4x64xf32>, vector<4x64xf32> -> vector<12x64xf32>
    %cst_83 = arith.constant dense<0.000000e+00> : vector<16x64xf32>
    %228 = tpu.matmul %0, %227, %cst_83 {dimension_numbers = #tpu.dot_dimension_numbers<[1], [0], [0], [1], [0, 0, 1, 1], [], []>} : vector<16x12xf32>, vector<12x64xf32>, vector<16x64xf32> -> vector<16x64xf32>
    %229 = vector.broadcast %1 : vector<16x1xf32> to vector<16x64xf32>
    %230 = arith.addf %228, %229 : vector<16x64xf32>
    %cst_84 = arith.constant 0.000000e+00 : f32
    %231 = vector.broadcast %cst_84 : f32 to vector<16x64xf32>
    %232 = arith.maximumf %230, %231 : vector<16x64xf32>
    %233 = vector.extract_strided_slice %232 {offsets = [0, 1], sizes = [16, 63], strides = [1, 1]} : vector<16x64xf32> to vector<16x63xf32>
    %234 = tpu.concatenate %233, %21 in 1 : vector<16x63xf32>, vector<16x1xf32> -> vector<16x64xf32>
    %235 = arith.maximumf %232, %234 : vector<16x64xf32>
    %cst_85 = arith.constant dense<0.000000e+00> : vector<16x32xf32>
    %236 = tpu.matmul %235, %11, %cst_85 {dimension_numbers = #tpu.dot_dimension_numbers<[1], [0], [0], [1], [0, 0, 1, 1], [], []>} : vector<16x64xf32>, vector<64x32xf32>, vector<16x32xf32> -> vector<16x32xf32>
    %237 = vector.extract_strided_slice %236 {offsets = [0, 0], sizes = [16, 31], strides = [1, 1]} : vector<16x32xf32> to vector<16x31xf32>
    %238 = tpu.concatenate %21, %237 in 1 : vector<16x1xf32>, vector<16x31xf32> -> vector<16x32xf32>
    %239 = vector.extract_strided_slice %236 {offsets = [0, 1], sizes = [16, 31], strides = [1, 1]} : vector<16x32xf32> to vector<16x31xf32>
    %240 = tpu.concatenate %239, %21 in 1 : vector<16x31xf32>, vector<16x1xf32> -> vector<16x32xf32>
    %241 = tpu.concatenate %238, %236, %240 in 0 : vector<16x32xf32>, vector<16x32xf32>, vector<16x32xf32> -> vector<48x32xf32>
    %cst_86 = arith.constant dense<0.000000e+00> : vector<32x32xf32>
    %242 = tpu.matmul %2, %241, %cst_86 {dimension_numbers = #tpu.dot_dimension_numbers<[1], [0], [0], [1], [0, 0, 1, 1], [], []>} : vector<32x48xf32>, vector<48x32xf32>, vector<32x32xf32> -> vector<32x32xf32>
    %243 = vector.broadcast %3 : vector<32x1xf32> to vector<32x32xf32>
    %244 = arith.addf %242, %243 : vector<32x32xf32>
    %cst_87 = arith.constant 0.000000e+00 : f32
    %245 = vector.broadcast %cst_87 : f32 to vector<32x32xf32>
    %246 = arith.maximumf %244, %245 : vector<32x32xf32>
    %247 = vector.extract_strided_slice %246 {offsets = [0, 1], sizes = [32, 31], strides = [1, 1]} : vector<32x32xf32> to vector<32x31xf32>
    %248 = tpu.concatenate %247, %22 in 1 : vector<32x31xf32>, vector<32x1xf32> -> vector<32x32xf32>
    %249 = arith.maximumf %246, %248 : vector<32x32xf32>
    %cst_88 = arith.constant dense<0.000000e+00> : vector<32x16xf32>
    %250 = tpu.matmul %249, %19, %cst_88 {dimension_numbers = #tpu.dot_dimension_numbers<[1], [0], [0], [1], [0, 0, 1, 1], [], []>} : vector<32x32xf32>, vector<32x16xf32>, vector<32x16xf32> -> vector<32x16xf32>
    %c6_89 = arith.constant 6 : index
    %c0_90 = arith.constant 0 : index
    %c0_91 = arith.constant 0 : index
    %251 = vector.load %arg6[%c6_89, %c0_90, %c0_91] : memref<8x32x16xf32, #tpu.memory_space<vmem>>, vector<1x32x16xf32>
    %252 = vector.shape_cast %251 : vector<1x32x16xf32> to vector<32x16xf32>
    %253 = vector.shape_cast %250 : vector<32x16xf32> to vector<1x32x16xf32>
    tpu.vector_store %arg6[%c6_89, %c0_90, %c0_91], %253 {strides = array<i32>} : memref<8x32x16xf32, #tpu.memory_space<vmem>>, vector<1x32x16xf32>,
    %c7 = arith.constant 7 : index
    %c0_92 = arith.constant 0 : index
    %c0_93 = arith.constant 0 : index
    %254 = vector.load %arg1[%c7, %c0_92, %c0_93] : memref<8x4x64xf32, #tpu.memory_space<vmem>>, vector<1x4x64xf32>
    %255 = vector.shape_cast %254 : vector<1x4x64xf32> to vector<4x64xf32>
    %256 = vector.extract_strided_slice %255 {offsets = [0, 0], sizes = [4, 63], strides = [1, 1]} : vector<4x64xf32> to vector<4x63xf32>
    %257 = tpu.concatenate %20, %256 in 1 : vector<4x1xf32>, vector<4x63xf32> -> vector<4x64xf32>
    %258 = vector.extract_strided_slice %255 {offsets = [0, 1], sizes = [4, 63], strides = [1, 1]} : vector<4x64xf32> to vector<4x63xf32>
    %259 = tpu.concatenate %258, %20 in 1 : vector<4x63xf32>, vector<4x1xf32> -> vector<4x64xf32>
    %260 = tpu.concatenate %257, %255, %259 in 0 : vector<4x64xf32>, vector<4x64xf32>, vector<4x64xf32> -> vector<12x64xf32>
    %cst_94 = arith.constant dense<0.000000e+00> : vector<16x64xf32>
    %261 = tpu.matmul %0, %260, %cst_94 {dimension_numbers = #tpu.dot_dimension_numbers<[1], [0], [0], [1], [0, 0, 1, 1], [], []>} : vector<16x12xf32>, vector<12x64xf32>, vector<16x64xf32> -> vector<16x64xf32>
    %262 = vector.broadcast %1 : vector<16x1xf32> to vector<16x64xf32>
    %263 = arith.addf %261, %262 : vector<16x64xf32>
    %cst_95 = arith.constant 0.000000e+00 : f32
    %264 = vector.broadcast %cst_95 : f32 to vector<16x64xf32>
    %265 = arith.maximumf %263, %264 : vector<16x64xf32>
    %266 = vector.extract_strided_slice %265 {offsets = [0, 1], sizes = [16, 63], strides = [1, 1]} : vector<16x64xf32> to vector<16x63xf32>
    %267 = tpu.concatenate %266, %21 in 1 : vector<16x63xf32>, vector<16x1xf32> -> vector<16x64xf32>
    %268 = arith.maximumf %265, %267 : vector<16x64xf32>
    %cst_96 = arith.constant dense<0.000000e+00> : vector<16x32xf32>
    %269 = tpu.matmul %268, %11, %cst_96 {dimension_numbers = #tpu.dot_dimension_numbers<[1], [0], [0], [1], [0, 0, 1, 1], [], []>} : vector<16x64xf32>, vector<64x32xf32>, vector<16x32xf32> -> vector<16x32xf32>
    %270 = vector.extract_strided_slice %269 {offsets = [0, 0], sizes = [16, 31], strides = [1, 1]} : vector<16x32xf32> to vector<16x31xf32>
    %271 = tpu.concatenate %21, %270 in 1 : vector<16x1xf32>, vector<16x31xf32> -> vector<16x32xf32>
    %272 = vector.extract_strided_slice %269 {offsets = [0, 1], sizes = [16, 31], strides = [1, 1]} : vector<16x32xf32> to vector<16x31xf32>
    %273 = tpu.concatenate %272, %21 in 1 : vector<16x31xf32>, vector<16x1xf32> -> vector<16x32xf32>
    %274 = tpu.concatenate %271, %269, %273 in 0 : vector<16x32xf32>, vector<16x32xf32>, vector<16x32xf32> -> vector<48x32xf32>
    %cst_97 = arith.constant dense<0.000000e+00> : vector<32x32xf32>
    %275 = tpu.matmul %2, %274, %cst_97 {dimension_numbers = #tpu.dot_dimension_numbers<[1], [0], [0], [1], [0, 0, 1, 1], [], []>} : vector<32x48xf32>, vector<48x32xf32>, vector<32x32xf32> -> vector<32x32xf32>
    %276 = vector.broadcast %3 : vector<32x1xf32> to vector<32x32xf32>
    %277 = arith.addf %275, %276 : vector<32x32xf32>
    %cst_98 = arith.constant 0.000000e+00 : f32
    %278 = vector.broadcast %cst_98 : f32 to vector<32x32xf32>
    %279 = arith.maximumf %277, %278 : vector<32x32xf32>
    %280 = vector.extract_strided_slice %279 {offsets = [0, 1], sizes = [32, 31], strides = [1, 1]} : vector<32x32xf32> to vector<32x31xf32>
    %281 = tpu.concatenate %280, %22 in 1 : vector<32x31xf32>, vector<32x1xf32> -> vector<32x32xf32>
    %282 = arith.maximumf %279, %281 : vector<32x32xf32>
    %cst_99 = arith.constant dense<0.000000e+00> : vector<32x16xf32>
    %283 = tpu.matmul %282, %19, %cst_99 {dimension_numbers = #tpu.dot_dimension_numbers<[1], [0], [0], [1], [0, 0, 1, 1], [], []>} : vector<32x32xf32>, vector<32x16xf32>, vector<32x16xf32> -> vector<32x16xf32>
    %c7_100 = arith.constant 7 : index
    %c0_101 = arith.constant 0 : index
    %c0_102 = arith.constant 0 : index
    %284 = vector.load %arg6[%c7_100, %c0_101, %c0_102] : memref<8x32x16xf32, #tpu.memory_space<vmem>>, vector<1x32x16xf32>
    %285 = vector.shape_cast %284 : vector<1x32x16xf32> to vector<32x16xf32>
    %286 = vector.shape_cast %283 : vector<32x16xf32> to vector<1x32x16xf32>
    tpu.vector_store %arg6[%c7_100, %c0_101, %c0_102], %286 {strides = array<i32>} : memref<8x32x16xf32, #tpu.memory_space<vmem>>, vector<1x32x16xf32>,
    return
  }
  func.func @transform_0(%arg0: i32) -> (i32, i32, i32) {
    %c0_i32 = arith.constant 0 : i32
    %c0_i32_0 = arith.constant 0 : i32
    %c0_i32_1 = arith.constant 0 : i32
    return %arg0, %c0_i32, %c0_i32_0 : i32, i32, i32
  }
  func.func @transform_1(%arg0: i32) -> (i32, i32) {
    %c0_i32 = arith.constant 0 : i32
    %c0_i32_0 = arith.constant 0 : i32
    %c0_i32_1 = arith.constant 0 : i32
    return %c0_i32, %c0_i32_0 : i32, i32
  }
  func.func @transform_2(%arg0: i32) -> (i32, i32) {
    %c0_i32 = arith.constant 0 : i32
    %c0_i32_0 = arith.constant 0 : i32
    %c0_i32_1 = arith.constant 0 : i32
    return %c0_i32, %c0_i32_0 : i32, i32
  }
  func.func @transform_3(%arg0: i32) -> (i32, i32) {
    %c0_i32 = arith.constant 0 : i32
    %c0_i32_0 = arith.constant 0 : i32
    %c0_i32_1 = arith.constant 0 : i32
    return %c0_i32, %c0_i32_0 : i32, i32
  }
  func.func @transform_4(%arg0: i32) -> (i32, i32) {
    %c0_i32 = arith.constant 0 : i32
    %c0_i32_0 = arith.constant 0 : i32
    %c0_i32_1 = arith.constant 0 : i32
    return %c0_i32, %c0_i32_0 : i32, i32
  }
  func.func @transform_5(%arg0: i32) -> (i32, i32, i32) {
    %c0_i32 = arith.constant 0 : i32
    %c0_i32_0 = arith.constant 0 : i32
    %c0_i32_1 = arith.constant 0 : i32
    return %arg0, %c0_i32, %c0_i32_0 : i32, i32, i32
  }
}

</mosaic_0001>

<bundles_post_ra>
// kernel: signal_encoder.1
= control target key start
LH: loop header
LB: loop body
LE: loop exit
PB: predicated region body
PF: predicated region fallthrough
CT: control target
= control target key end

     0   :  { %s5271_s18 = smov 0   ;;  %s6238_s0 = inlined_call_operand.vmem [shape: f32[16,4,64], index: 0, kind: input, shape index: {}]   ;;  %s6239_s1 = inlined_call_operand.vmem [shape: f32[16,12], index: 1, kind: input, shape index: {}]   ;;  %s6240_s2 = inlined_call_operand.vmem [shape: f32[16,1], index: 2, kind: input, shape index: {}]   ;;  %s6241_s3 = inlined_call_operand.vmem [shape: f32[32,48], index: 3, kind: input, shape index: {}]   ;;  %s6242_s4 = inlined_call_operand.vmem [shape: f32[32,1], index: 4, kind: input, shape index: {}]   ;;  %s6243_s5 = inlined_call_operand.vmem [shape: f32[16,32,16], index: 5, kind: output, shape index: {}]  }
   0x1 LB: > { %s3743_s19 = sadd.s32 4294967295, %s5234_s18   ;;  %p3747_p0 = scmp.ge.s32.totalorder %s5234_s18, 1  ;;  %s5234_s18 = sphi %s5271_s18, %s15_s18  }
   0x2   : > { %p188_p1 = scmp.lt.s32.totalorder %s5234_s18, 3 }
   0x4   : > { %p189_p2 = pnand %p3747_p0, %p188_p1 }
   0x5   : > { %s3748_s20 = sshll.u32 (!%p189_p2), %s3743_s19, 3  ;;  %v5284_v0 = vld [vmem:[%s6239_s1] sm:$0xff] (!%p189_p2)  ;;  %vm296_vm0 = vcmask (!%p189_p2), 97280   ;;  %v5236_v3 = vmov (!%p189_p2), 0   ;;  %s5237_s29 = smov (!%p189_p2), 1   ;;  %v233_v4 = vld [vmem:[%s6240_s2 + $0x8] sm:$0xff] (!%p189_p2)  ;;  %v242_v14 = vlaneseq (!%p189_p2) }
   0x6   : > { %192 = sbr.rel (%p189_p2) target bundleno = 3843 (0xf03), region = 40  ;;  %p218_p3 = scmp.lt.s32.totalorder (!%p189_p2), %s3748_s20, 15  ;;  %4299 = vmatprep.mubr.msk.f32.mxu1 (!%p189_p2), %vm296_vm0, %v5284_v0  ;;  %v232_v1 = vld [vmem:[%s6240_s2] sm:$0xff] (!%p189_p2)  ;;  %5140 = vset.pattern.permute.xlu1 (!%p189_p2), %v5236_v3  ;;  %vm275_vm1 = vcmask (!%p189_p2), 7168   ;;  %vm280_vm2 = vcmask (!%p189_p2), 515072   ;;  %vm284_vm3 = vcmask (!%p189_p2), 1043456  }
   0x7   : > { %5151 = vset.pattern.permute.xlu0 (!%p189_p2), %v5236_v3  ;;  %288 = vperm.xlu1 (!%p189_p2), %5140, %v232_v1   ;;  %s5238_s7 = smov (!%p189_p2), 127   ;;  %vm5239_vm4 = vmmov (!%p189_p2), 1   ;;  %v5318_v13 = vld [vmem:[%s6239_s1 + $0x8] sm:$0xff] (!%p189_p2)  ;;  %v243_v15 = vshrl.u32 (!%p189_p2), %v242_v14, 7  ;;  %v252_v16 = vand.u32 (!%p189_p2), 127, %v242_v14  ;;  %v5417_v56 = vld [vmem:[%s6241_s3] sm:$0xff] (!%p189_p2) }
   0x8   : > { %vm5307_vm5 = vmpackc.low (!%p189_p2), %vm284_vm3, %vm5239_vm4  ;;  %v5240_v24 = vmov (!%p189_p2), 1.0|1.0   ;;  %v239_v1 = vld [vmem:[%s6242_s4 + $0x8] sm:$0xff] (!%p189_p2)  ;;  %v238_v3 = vld [vmem:[%s6242_s4] sm:$0xff] (!%p189_p2) }
   0x9   : > { %v244_v17 = vadd.s32 (!%p189_p2), 8, %v243_v15  ;;  %v253_v18 = vmul.u32 (!%p189_p2), 2, %v252_v16  ;;  %v245_v19 = vadd.s32 (!%p189_p2), 16, %v243_v15  ;;  %v246_v20 = vadd.s32 (!%p189_p2), 24, %v243_v15  ;;  %v6057_v11 = vld [vmem:[%s6241_s3 + $0x18] sm:$0xff] (!%p189_p2) }
   0xa   : > { %v247_v21 = vadd.s32 (!%p189_p2), 32, %v243_v15  ;;  %v248_v22 = vadd.s32 (!%p189_p2), 40, %v243_v15  ;;  %v249_v27 = vadd.s32 (!%p189_p2), 48, %v243_v15  ;;  %v250_v28 = vadd.s32 (!%p189_p2), 56, %v243_v15 }
   0xb   : > { %293 = vperm.xlu1 (!%p189_p2), %5140, %v233_v4   ;;  %vm254_vm6 = vcmp.eq.s32.totalorder (!%p189_p2), %v243_v15, %v253_v18  ;;  %vm255_vm7 = vcmp.eq.s32.totalorder (!%p189_p2), %v244_v17, %v253_v18  ;;  %vm256_vm8 = vcmp.eq.s32.totalorder (!%p189_p2), %v245_v19, %v253_v18  ;;  %vm257_vm9 = vcmp.eq.s32.totalorder (!%p189_p2), %v246_v20, %v253_v18  ;;  %v241_v4 = vld [vmem:[%s6242_s4 + $0x18] sm:$0xff] (!%p189_p2) }
   0xc   : > { %vm5322_vm10 = vmpackc.low (!%p189_p2), %vm255_vm7, %vm254_vm6  ;;  %vm258_vm12 = vcmp.eq.s32.totalorder (!%p189_p2), %v247_v21, %v253_v18  ;;  %vm259_vm13 = vcmp.eq.s32.totalorder (!%p189_p2), %v248_v22, %v253_v18  ;;  %vm260_vm15 = vcmp.eq.s32.totalorder (!%p189_p2), %v249_v27, %v253_v18  ;;  %vm261_vm4 = vcmp.eq.s32.totalorder (!%p189_p2), %v250_v28, %v253_v18 }
   0xd   : > { %s6259_s20 = smov (!%p218_p3, %s3748_s20), 15  ;;  %vm5329_vm11 = vmpackc.low %vm257_vm9, %vm256_vm8  ;;  %vm395_vm7 = vcmask 523264   ;;  %vm516_vm8 = vcmask 392192  }
   0xe   : > { %s3749_s23 = sshll.u32 %s6259_s20, 2  ;;  %vm5339_vm14 = vmpackc.low %vm259_vm13, %vm258_vm12  ;;  %4333 = vmatprep.mubr.msk.f32.mxu0 %vm516_vm8, %v5417_v56  ;;  %vm493_vm13 = vcmask 252928   ;;  %s4038_s30 = sshll.u32 %s6259_s20, 5 }
   0xf   : > { %s5292_s26 = scalar_lea.vmem %s6238_s0, %s3749_s23  ;;  %vm5352_vm6 = vmpackc.low %vm261_vm4, %vm260_vm15  ;;  %vm642_vm4 = vcmask 261120   ;;  %s5639_s9 = scalar_lea.vmem %s6243_s5, %s4038_s30 }
  0x10   : > { %v270_v2 = vld [vmem:[%s5292_s26] sm:$0xf]  ;;  %v3784_v38 = vld [vmem:[%s5292_s26 + $0x4] sm:$0xf]  ;;  %v3820_v63 = vld [vmem:[%s5292_s26 + $0x8] sm:$0xf] }
  0x11   : > { %272 = vrot.lane.b32.xlu0 %v270_v2, %s5237_s29  ;;  %v282_v6 = vrot.slane %v270_v2, 4  ;;  %v756_v43 = vrot.slane %v3784_v38, 4  ;;  %vm3766_vm9 = vmneg %vm275_vm1  ;;  %v1176_v21 = vrot.slane %v3820_v63, 4 }
  0x12   : > { %vm5441_vm12 = vmpackc.low %vm3766_vm9, %vm3766_vm9  ;;  %vm740_vm9 = vcmask 130048  }
  0x13   : > { %vm5451_vm15 = vmpackc.low %vm493_vm13, %vm493_vm13 }
  0x15   : > { %277 = vrot.lane.b32.xlu0 %v270_v2, %s5238_s7  ;;  %v240_v2 = vld [vmem:[%s6242_s4 + $0x10] sm:$0xff] }
  0x83   : > { %v273_v5 = vpop.permute.xlu0 %272 }
  0x84   : > { %v276_v7 = vsel %vm275_vm1, 0.0, %v273_v5 }
  0x85   : > { %v285_v10 = vsel %vm284_vm3, %v276_v7, %v282_v6 }
  0x86   : > { %v5359_v30 = vpop.permute.xlu1 %288 }
  0x87   : > { %v278_v8 = vpop.permute.xlu0 %277 }
  0x88   : > { %v281_v9 = vsel %vm280_vm2, %v278_v8, 0.0 }
  0x89   : > { %v4759_v12 = vpack.c.bf16 %v281_v9, %v285_v10 }
  0x8a   : > { %v5364_v31 = vpop.permute.xlu1 %293 }
  0x8b   : > { %4761 = vmatprep.subr.msk.bf16.mxu1 %vm5307_vm5, %v4759_v12 }
  0x8c   : > { %4764 = vmatpush3.bf16.msk.msra.mxu1 %vm5307_vm5, %v4759_v12 }
  0x8d   : > { %4766 = vmatprep.subr.msk.bf16.mxu1 %vm5322_vm10, %v5240_v24 }
  0x8f   : > { %4300 = vmatmul.mubr.msk.f32.vlgmr.msra.gmra.mrb[0].mxu1 %vm296_vm0, %v5318_v13 }
  0x90   : > { %4768 = vmatpush3.bf16.msk.msra.mxu1 %vm5322_vm10, %v5240_v24 }
  0x91   : > { %4770 = vmatprep.subr.msk.bf16.mxu1 %vm5329_vm11, %v5240_v24 }
  0x94   : > { %4772 = vmatpush3.bf16.msk.msra.mxu1 %vm5329_vm11, %v5240_v24 }
  0x95   : > { %4774 = vmatprep.subr.msk.bf16.mxu1 %vm5339_vm14, %v5240_v24 }
  0x98   : > { %4776 = vmatpush3.bf16.msk.msra.mxu1 %vm5339_vm14, %v5240_v24 }
  0x99   : > { %4778 = vmatprep.subr.msk.bf16.mxu1 %vm5352_vm6, %v5240_v24 }
  0x9c   : > { %4780 = vmatpush3.bf16.msk.msra.mxu1 %vm5352_vm6, %v5240_v24 }
 0x162   : > { %v4301_v32 = vpop.f32.mrb[0].mxu1 }
 0x163   : > { %v378_v33 = vadd.f32 %v4301_v32, %v5364_v31  ;;  %v372_v34 = vpop.f32.mrb[1].mxu1 }
 0x164   : > { %v373_v35 = vadd.f32 %v372_v34, %v5359_v30  ;;  %v5466_v34 = vld [vmem:[%s6241_s3 + $0x8] sm:$0xff] }
 0x165   : > { %v382_v36 = vmax.f32 %v378_v33, 0.0 }
 0x166   : > { %v381_v37 = vmax.f32 %v373_v35, 0.0 }
 0x167   : > { %387 = vrot.lane.b32.xlu1 %v382_v36, %s5238_s7 }
 0x168   : > { %385 = vrot.lane.b32.xlu0 %v381_v37, %s5238_s7 }
 0x16b   : > { %752 = vrot.lane.b32.xlu1 %v3784_v38, %s5238_s7 }
 0x16c   : > { %748 = vrot.lane.b32.xlu0 %v3784_v38, %s5237_s29 }
 0x1d9   : > { %v388_v39 = vpop.permute.xlu1 %387 }
 0x1da   : > { %v392_v40 = vsel %vm280_vm2, %v388_v39, 0.0  ;;  %v386_v41 = vpop.permute.xlu0 %385  ;;  %v5488_v39 = vld [vmem:[%s6241_s3 + $0x18] sm:$0xff] }
 0x1db   : > { %v391_v42 = vsel %vm280_vm2, %v386_v41, 0.0  ;;  %v394_v45 = vmax.f32 %v382_v36, %v392_v40  ;;  %v5473_v36 = vld [vmem:[%s6241_s3 + $0x10] sm:$0xff] }
 0x1dc   : > { %v393_v44 = vmax.f32 %v381_v37, %v391_v42 }
 0x1dd   : > { %v753_v46 = vpop.permute.xlu1 %752 }
 0x1de   : > { %4318 = vmatprep.mubr.msk.f32.mxu1 %vm395_vm7, %v393_v44  ;;  %v749_v47 = vpop.permute.xlu0 %748  ;;  %v755_v48 = vsel %vm280_vm2, %v753_v46, 0.0 }
 0x1df   : > { %v751_v49 = vsel %vm275_vm1, 0.0, %v749_v47  ;;  %4319 = vmatmul.mubr.msk.f32.vlgmr.msra.gmra.mrb[2].mxu1 %vm395_vm7, %v394_v45 }
 0x1e0   : > { %v758_v50 = vsel %vm284_vm3, %v751_v49, %v756_v43  ;;  %4357 = vmatprep.mubr.msk.f32.mxu1 %vm296_vm0, %v5284_v0 }
 0x1e1   : > { %v4805_v51 = vpack.c.bf16 %v755_v48, %v758_v50 }
 0x1e3   : > { %4807 = vmatprep.subr.msk.bf16.mxu1 %vm5307_vm5, %v4805_v51 }
 0x1e4   : > { %4810 = vmatpush3.bf16.msk.msra.mxu1 %vm5307_vm5, %v4805_v51 }
 0x1e5   : > { %4812 = vmatprep.subr.msk.bf16.mxu1 %vm5322_vm10, %v5240_v24 }
 0x1e7   : > { %4358 = vmatmul.mubr.msk.f32.vlgmr.msra.gmra.mrb[4].mxu1 %vm296_vm0, %v5318_v13 }
 0x1e8   : > { %4814 = vmatpush3.bf16.msk.msra.mxu1 %vm5322_vm10, %v5240_v24 }
 0x1e9   : > { %4816 = vmatprep.subr.msk.bf16.mxu1 %vm5329_vm11, %v5240_v24 }
 0x1ec   : > { %4818 = vmatpush3.bf16.msk.msra.mxu1 %vm5329_vm11, %v5240_v24 }
 0x1ed   : > { %4820 = vmatprep.subr.msk.bf16.mxu1 %vm5339_vm14, %v5240_v24 }
 0x1f0   : > { %4822 = vmatpush3.bf16.msk.msra.mxu1 %vm5339_vm14, %v5240_v24 }
 0x1f1   : > { %4824 = vmatprep.subr.msk.bf16.mxu1 %vm5352_vm6, %v5240_v24 }
 0x1f4   : > { %4826 = vmatpush3.bf16.msk.msra.mxu1 %vm5352_vm6, %v5240_v24 }
 0x2b2   : > { %v4320_v52 = vpop.f32.mrb[2].mxu1 }
 0x2b3   : > { %v468_v53 = vpop.f32.mrb[3].mxu1 }
 0x2b4   : > { %v5146_v54 = vpack.i.bf16 %v4320_v52, %v468_v53  ;;  %v4787_v55 = vpack.c.bf16 %v4320_v52, %v468_v53 }
 0x2b6   : > { %5147 = vrot.lane.b32.xlu1 %v5146_v54, %s5238_s7  ;;  %5142 = vrot.lane.b32.xlu0 %v5146_v54, %s5237_s29 }
 0x2ba   : > { %v4359_v57 = vpop.f32.mrb[4].mxu1 }
 0x2bb   : > { %v834_v58 = vadd.f32 %v4359_v57, %v5364_v31  ;;  %v828_v59 = vpop.f32.mrb[5].mxu1 }
 0x2bc   : > { %v829_v60 = vadd.f32 %v828_v59, %v5359_v30 }
 0x2bd   : > { %v838_v61 = vmax.f32 %v834_v58, 0.0 }
 0x2be   : > { %v837_v62 = vmax.f32 %v829_v60, 0.0 }
 0x2bf   : > { %843 = vrot.lane.b32.xlu1 %v838_v61, %s5238_s7 }
 0x2c0   : > { %841 = vrot.lane.b32.xlu0 %v837_v62, %s5238_s7 }
 0x2c3   : > { %1172 = vrot.lane.b32.xlu1 %v3820_v63, %s5238_s7 }
 0x2c4   : > { %1168 = vrot.lane.b32.xlu0 %v3820_v63, %s5237_s29 }
 0x2c7   : > { %503 = vperm.xlu1 %5140, %v239_v1  }
 0x2c8   : > { %498 = vperm.xlu0 %5151, %v238_v3  }
 0x2cb   : > { %508 = vperm.xlu1 %5140, %v240_v2  }
 0x2cc   : > { %513 = vperm.xlu0 %5151, %v241_v4   ;;  %v3856_v4 = vld [vmem:[%s5292_s26 + $0xc] sm:$0xf] }
 0x328   : > { %v5143_v5 = vpop.permute.xlu0 %5142  ;;  %v5148_v9 = vpop.permute.xlu1 %5147 }
 0x329   : > { %v5145_v6 = vunpack.i.h.bf16 %v5143_v5  ;;  %v5144_v7 = vunpack.i.l.bf16 %v5143_v5  ;;  %v5150_v12 = vunpack.i.h.bf16 %v5148_v9  ;;  %v5149_v14 = vunpack.i.l.bf16 %v5148_v9 }
 0x32b   : > { %v4781_v10 = vpack.c.bf16 %v5145_v6, %v5144_v7  ;;  %v4791_v16 = vpack.c.bf16 %v5150_v12, %v5149_v14 }
 0x32d   : > { %4783 = vmatprep.subr.msk.bf16.mxu0 %vm5441_vm12, %v4781_v10 }
 0x32e   : > { %4786 = vmatpush3.bf16.msk.msra.mxu0 %vm5441_vm12, %v4781_v10 }
 0x32f   : > { %4788 = vmatprep.subr.bf16.mxu0 %v4787_v55 }
 0x331   : > { %v844_v17 = vpop.permute.xlu1 %843 }
 0x332   : > { %v848_v18 = vsel %vm280_vm2, %v844_v17, 0.0  ;;  %v842_v19 = vpop.permute.xlu0 %841  ;;  %4790 = vmatpush3.bf16.msra.mxu0 %v4787_v55 }
 0x333   : > { %v847_v20 = vsel %vm280_vm2, %v842_v19, 0.0  ;;  %4793 = vmatprep.subr.msk.bf16.mxu0 %vm5451_vm15, %v4791_v16  ;;  %v850_v27 = vmax.f32 %v838_v61, %v848_v18 }
 0x334   : > { %v849_v22 = vmax.f32 %v837_v62, %v847_v20 }
 0x335   : > { %v1173_v28 = vpop.permute.xlu1 %1172 }
 0x336   : > { %4376 = vmatprep.mubr.msk.f32.mxu1 %vm395_vm7, %v849_v22  ;;  %v1169_v32 = vpop.permute.xlu0 %1168  ;;  %4796 = vmatpush3.bf16.msk.msra.mxu0 %vm5451_vm15, %v4791_v16  ;;  %v1175_v33 = vsel %vm280_vm2, %v1173_v28, 0.0 }
 0x337   : > { %v1171_v35 = vsel %vm275_vm1, 0.0, %v1169_v32  ;;  %4377 = vmatmul.mubr.msk.f32.vlgmr.msra.gmra.mrb[6].mxu1 %vm395_vm7, %v850_v27  ;;  %4798 = vmatprep.subr.msk.bf16.mxu0 %vm5322_vm10, %v5240_v24 }
 0x338   : > { %v1178_v37 = vsel %vm284_vm3, %v1171_v35, %v1176_v21  ;;  %4415 = vmatprep.mubr.msk.f32.mxu1 %vm296_vm0, %v5284_v0 }
 0x339   : > { %v4851_v38 = vpack.c.bf16 %v1175_v33, %v1178_v37  ;;  %4334 = vmatmul.mubr.msk.f32.vlgmr.msra.gmra.mrb[0].mxu0 %vm516_vm8, %v5466_v34 }
 0x33a   : > { %4336 = vmatprep.mubr.msk.f32.mxu0 %vm516_vm8, %v5473_v36  ;;  %4800 = vmatpush3.bf16.msk.msra.mxu0 %vm5322_vm10, %v5240_v24 }
 0x33b   : > { %4853 = vmatprep.subr.msk.bf16.mxu1 %vm5307_vm5, %v4851_v38  ;;  %4802 = vmatprep.subr.msk.bf16.mxu0 %vm5329_vm11, %v5240_v24 }
 0x33c   : > { %4856 = vmatpush3.bf16.msk.msra.mxu1 %vm5307_vm5, %v4851_v38 }
 0x33d   : > { %4337 = vmatmul.mubr.msk.f32.gmra.mrb[2].mxu0 %vm516_vm8, %v5488_v39  ;;  %4858 = vmatprep.subr.msk.bf16.mxu1 %vm5322_vm10, %v5240_v24 }
 0x33e   : > { %4804 = vmatpush3.bf16.msk.msra.mxu0 %vm5329_vm11, %v5240_v24 }
 0x33f   : > { %4416 = vmatmul.mubr.msk.f32.vlgmr.msra.gmra.mrb[8].mxu1 %vm296_vm0, %v5318_v13 }
 0x340   : > { %4860 = vmatpush3.bf16.msk.msra.mxu1 %vm5322_vm10, %v5240_v24 }
 0x341   : > { %4862 = vmatprep.subr.msk.bf16.mxu1 %vm5329_vm11, %v5240_v24 }
 0x344   : > { %4864 = vmatpush3.bf16.msk.msra.mxu1 %vm5329_vm11, %v5240_v24 }
 0x345   : > { %4866 = vmatprep.subr.msk.bf16.mxu1 %vm5339_vm14, %v5240_v24 }
 0x346   : > { %v5531_v41 = vpop.permute.xlu1 %503 }
 0x347   : > { %v5535_v46 = vpop.permute.xlu0 %498 }
 0x348   : > { %4868 = vmatpush3.bf16.msk.msra.mxu1 %vm5339_vm14, %v5240_v24 }
 0x349   : > { %4870 = vmatprep.subr.msk.bf16.mxu1 %vm5352_vm6, %v5240_v24 }
 0x34a   : > { %v5539_v53 = vpop.permute.xlu1 %508 }
 0x34b   : > { %v5544_v58 = vpop.permute.xlu0 %513 }
 0x34c   : > { %4872 = vmatpush3.bf16.msk.msra.mxu1 %vm5352_vm6, %v5240_v24 }
 0x40a   : > { %v4378_v40 = vpop.f32.mrb[6].mxu1 }
 0x40b   : > { %v923_v42 = vpop.f32.mrb[7].mxu1 }
 0x40c   : > { %v5157_v43 = vpack.i.bf16 %v4378_v40, %v923_v42  ;;  %v5533_v44 = vpack.c.bf16 %v4378_v40, %v923_v42  ;;  %v4335_v45 = vpop.f32.mrb[0].mxu0 }
 0x40d   : > { %v601_v47 = vadd.f32 %v4335_v45, %v5531_v41  ;;  %v595_v48 = vpop.f32.mrb[1].mxu0  ;;  %v1596_v45 = vrot.slane %v3856_v4, 4 }
 0x40e   : > { %v596_v49 = vadd.f32 %v595_v48, %v5535_v46 }
 0x40f   : > { %v615_v50 = vmax.f32 %v601_v47, 0.0 }
 0x410   : > { %v614_v51 = vmax.f32 %v596_v49, 0.0  ;;  %v4338_v52 = vpop.f32.mrb[2].mxu0 }
 0x411   : > { %624 = vrot.lane.b32.xlu0 %v615_v50, %s5238_s7  ;;  %v605_v54 = vpop.f32.mrb[3].mxu0  ;;  %v611_v60 = vadd.f32 %v4338_v52, %v5544_v58 }
 0x412   : > { %v606_v55 = vadd.f32 %v605_v54, %v5539_v53  ;;  %v4417_v57 = vpop.f32.mrb[8].mxu1  ;;  %622 = vrot.lane.b32.xlu1 %v614_v51, %s5238_s7 }
 0x413   : > { %v1248_v59 = vpop.f32.mrb[9].mxu1  ;;  %v617_v62 = vmax.f32 %v611_v60, 0.0  ;;  %v1254_v63 = vadd.f32 %v4417_v57, %v5364_v31 }
 0x414   : > { %v616_v61 = vmax.f32 %v606_v55, 0.0  ;;  %v1249_v1 = vadd.f32 %v1248_v59, %v5359_v30 }
 0x415   : > { %v1258_v2 = vmax.f32 %v1254_v63, 0.0 }
 0x416   : > { %626 = vrot.lane.b32.xlu0 %v616_v61, %s5238_s7  ;;  %5153 = vrot.lane.b32.xlu1 %v5157_v43, %s5237_s29  ;;  %v1257_v3 = vmax.f32 %v1249_v1, 0.0 }
 0x41a   : > { %5158 = vrot.lane.b32.xlu0 %v5157_v43, %s5238_s7  ;;  %628 = vrot.lane.b32.xlu1 %v617_v62, %s5238_s7 }
 0x41e   : > { %1263 = vrot.lane.b32.xlu0 %v1258_v2, %s5238_s7  ;;  %1261 = vrot.lane.b32.xlu1 %v1257_v3, %s5238_s7 }
 0x422   : > { %1588 = vrot.lane.b32.xlu1 %v3856_v4, %s5237_s29  ;;  %1592 = vrot.lane.b32.xlu0 %v3856_v4, %s5238_s7 }
 0x483   : > { %v625_v5 = vpop.permute.xlu0 %624 }
 0x484   : > { %v635_v6 = vsel %vm493_vm13, %v625_v5, 0.0  ;;  %v623_v7 = vpop.permute.xlu1 %622 }
 0x485   : > { %v634_v9 = vsel %vm493_vm13, %v623_v7, 0.0  ;;  %v639_v12 = vmax.f32 %v615_v50, %v635_v6 }
 0x486   : > { %v638_v10 = vmax.f32 %v614_v51, %v634_v9 }
 0x488   : > { %v627_v14 = vpop.permute.xlu0 %626  ;;  %4347 = vmatprep.mubr.msk.f32.mxu0 %vm642_vm4, %v638_v10  ;;  %v5154_v16 = vpop.permute.xlu1 %5153 }
 0x489   : > { %v636_v17 = vsel %vm493_vm13, %v627_v14, 0.0  ;;  %v5156_v18 = vunpack.i.h.bf16 %v5154_v16  ;;  %v5155_v19 = vunpack.i.l.bf16 %v5154_v16  ;;  %4348 = vmatmul.mubr.msk.f32.vlgmr.msra.gmra.mrb[4].mxu0 %vm642_vm4, %v639_v12 }
 0x48a   : > { %v640_v20 = vmax.f32 %v616_v61, %v636_v17 }
 0x48b   : > { %v4827_v21 = vpack.c.bf16 %v5156_v18, %v5155_v19 }
 0x48c   : > { %v5159_v22 = vpop.permute.xlu0 %5158  ;;  %4350 = vmatprep.mubr.msk.f32.mxu0 %vm642_vm4, %v640_v20  ;;  %v629_v27 = vpop.permute.xlu1 %628 }
 0x48d   : > { %v5161_v28 = vunpack.i.h.bf16 %v5159_v22  ;;  %v5160_v32 = vunpack.i.l.bf16 %v5159_v22  ;;  %v637_v33 = vsel %vm493_vm13, %v629_v27, 0.0  ;;  %4829 = vmatprep.subr.msk.bf16.mxu0 %vm5441_vm12, %v4827_v21 }
 0x48e   : > { %v641_v35 = vmax.f32 %v617_v62, %v637_v33  ;;  %4832 = vmatpush3.bf16.msk.msra.mxu0 %vm5441_vm12, %v4827_v21 }
 0x48f   : > { %4834 = vmatprep.subr.bf16.mxu0 %v5533_v44  ;;  %v4837_v40 = vpack.c.bf16 %v5161_v28, %v5160_v32  ;;  %v3892_v28 = vld [vmem:[%s5292_s26 + $0x10] sm:$0xf] }
 0x490   : > { %v1264_v37 = vpop.permute.xlu0 %1263  ;;  %4351 = vmatmul.mubr.msk.f32.gmra.mrb[6].mxu0 %vm642_vm4, %v641_v35  ;;  %v1262_v38 = vpop.permute.xlu1 %1261 }
 0x491   : > { %v1268_v42 = vsel %vm280_vm2, %v1264_v37, 0.0  ;;  %v1267_v43 = vsel %vm280_vm2, %v1262_v38, 0.0  ;;  %4391 = vmatprep.mubr.msk.f32.mxu0 %vm516_vm8, %v5417_v56 }
 0x492   : > { %v1270_v47 = vmax.f32 %v1258_v2, %v1268_v42  ;;  %v1269_v48 = vmax.f32 %v1257_v3, %v1267_v43  ;;  %4836 = vmatpush3.bf16.msra.mxu0 %v5533_v44 }
 0x493   : > { %4839 = vmatprep.subr.msk.bf16.mxu0 %vm5451_vm15, %v4837_v40 }
 0x494   : > { %4434 = vmatprep.mubr.msk.f32.mxu1 %vm395_vm7, %v1269_v48  ;;  %v1589_v49 = vpop.permute.xlu1 %1588  ;;  %v1593_v50 = vpop.permute.xlu0 %1592 }
 0x495   : > { %v1591_v51 = vsel %vm275_vm1, 0.0, %v1589_v49  ;;  %v1595_v52 = vsel %vm280_vm2, %v1593_v50, 0.0  ;;  %4435 = vmatmul.mubr.msk.f32.vlgmr.msra.gmra.mrb[10].mxu1 %vm395_vm7, %v1270_v47 }
 0x496   : > { %v1598_v54 = vsel %vm284_vm3, %v1591_v51, %v1596_v45  ;;  %4842 = vmatpush3.bf16.msk.msra.mxu0 %vm5451_vm15, %v4837_v40  ;;  %4473 = vmatprep.mubr.msk.f32.mxu1 %vm296_vm0, %v5284_v0 }
 0x497   : > { %v4897_v44 = vpack.c.bf16 %v1595_v52, %v1598_v54  ;;  %4844 = vmatprep.subr.msk.bf16.mxu0 %vm5322_vm10, %v5240_v24 }
 0x499   : > { %4392 = vmatmul.mubr.msk.f32.vlgmr.msra.gmra.mrb[8].mxu0 %vm516_vm8, %v5466_v34  ;;  %4899 = vmatprep.subr.msk.bf16.mxu1 %vm5307_vm5, %v4897_v44 }
 0x49a   : > { %4902 = vmatpush3.bf16.msk.msra.mxu1 %vm5307_vm5, %v4897_v44  ;;  %4394 = vmatprep.mubr.msk.f32.mxu0 %vm516_vm8, %v5473_v36 }
 0x49b   : > { %4846 = vmatpush3.bf16.msk.msra.mxu0 %vm5322_vm10, %v5240_v24  ;;  %4904 = vmatprep.subr.msk.bf16.mxu1 %vm5322_vm10, %v5240_v24 }
 0x49c   : > { %4848 = vmatprep.subr.msk.bf16.mxu0 %vm5329_vm11, %v5240_v24 }
 0x49d   : > { %4395 = vmatmul.mubr.msk.f32.gmra.mrb[10].mxu0 %vm516_vm8, %v5488_v39  ;;  %4474 = vmatmul.mubr.msk.f32.vlgmr.msra.gmra.mrb[12].mxu1 %vm296_vm0, %v5318_v13 }
 0x49e   : > { %4906 = vmatpush3.bf16.msk.msra.mxu1 %vm5322_vm10, %v5240_v24 }
 0x49f   : > { %4850 = vmatpush3.bf16.msk.msra.mxu0 %vm5329_vm11, %v5240_v24  ;;  %4908 = vmatprep.subr.msk.bf16.mxu1 %vm5329_vm11, %v5240_v24 }
 0x4a2   : > { %4910 = vmatpush3.bf16.msk.msra.mxu1 %vm5329_vm11, %v5240_v24 }
 0x4a3   : > { %4912 = vmatprep.subr.msk.bf16.mxu1 %vm5339_vm14, %v5240_v24 }
 0x4a6   : > { %4914 = vmatpush3.bf16.msk.msra.mxu1 %vm5339_vm14, %v5240_v24 }
 0x4a7   : > { %4916 = vmatprep.subr.msk.bf16.mxu1 %vm5352_vm6, %v5240_v24 }
 0x4aa   : > { %4918 = vmatpush3.bf16.msk.msra.mxu1 %vm5352_vm6, %v5240_v24 }
 0x55c   : > { %v4349_v55 = vpop.f32.mrb[4].mxu0 }
 0x55d   : > { %742 = vst.msk [vmem:[%s5639_s9 + $0x8] sm:$0xff] %vm740_vm9, %v4349_v55  ;;  %v721_v57 = vpop.f32.mrb[5].mxu0 }
 0x55e   : > { %741 = vst.msk [vmem:[%s5639_s9] sm:$0xff] %vm740_vm9, %v721_v57 }
 0x563   : > { %v4352_v59 = vpop.f32.mrb[6].mxu0 }
 0x564   : > { %744 = vst.msk [vmem:[%s5639_s9 + $0x18] sm:$0xff] %vm740_vm9, %v4352_v59  ;;  %v731_v60 = vpop.f32.mrb[7].mxu0 }
 0x565   : > { %743 = vst.msk [vmem:[%s5639_s9 + $0x10] sm:$0xff] %vm740_vm9, %v731_v60 }
 0x568   : > { %v4436_v61 = vpop.f32.mrb[10].mxu1 }
 0x569   : > { %v1343_v62 = vpop.f32.mrb[11].mxu1 }
 0x56a   : > { %v5167_v63 = vpack.i.bf16 %v4436_v61, %v1343_v62  ;;  %v5649_v1 = vpack.c.bf16 %v4436_v61, %v1343_v62 }
 0x56c   : > { %v4393_v2 = vpop.f32.mrb[8].mxu0 }
 0x56d   : > { %v1022_v3 = vadd.f32 %v4393_v2, %v5531_v41  ;;  %v1016_v4 = vpop.f32.mrb[9].mxu0  ;;  %v2016_v2 = vrot.slane %v3892_v28, 4 }
 0x56e   : > { %v1017_v5 = vadd.f32 %v1016_v4, %v5535_v46 }
 0x56f   : > { %v1036_v6 = vmax.f32 %v1022_v3, 0.0 }
 0x570   : > { %v1035_v7 = vmax.f32 %v1017_v5, 0.0  ;;  %v4396_v9 = vpop.f32.mrb[10].mxu0  ;;  %v4475_v10 = vpop.f32.mrb[12].mxu1 }
 0x571   : > { %v1668_v12 = vpop.f32.mrb[13].mxu1  ;;  %1045 = vrot.lane.b32.xlu0 %v1036_v6, %s5238_s7  ;;  %v1026_v14 = vpop.f32.mrb[11].mxu0  ;;  %v1032_v17 = vadd.f32 %v4396_v9, %v5544_v58  ;;  %v1674_v20 = vadd.f32 %v4475_v10, %v5364_v31 }
 0x572   : > { %v1027_v16 = vadd.f32 %v1026_v14, %v5539_v53  ;;  %1043 = vrot.lane.b32.xlu1 %v1035_v7, %s5238_s7  ;;  %v1669_v21 = vadd.f32 %v1668_v12, %v5359_v30 }
 0x573   : > { %v1038_v19 = vmax.f32 %v1032_v17, 0.0  ;;  %v1678_v22 = vmax.f32 %v1674_v20, 0.0 }
 0x574   : > { %v1037_v18 = vmax.f32 %v1027_v16, 0.0  ;;  %v1677_v27 = vmax.f32 %v1669_v21, 0.0 }
 0x576   : > { %1047 = vrot.lane.b32.xlu0 %v1037_v18, %s5238_s7  ;;  %5163 = vrot.lane.b32.xlu1 %v5167_v63, %s5237_s29 }
 0x57a   : > { %5168 = vrot.lane.b32.xlu0 %v5167_v63, %s5238_s7  ;;  %1049 = vrot.lane.b32.xlu1 %v1038_v19, %s5238_s7 }
 0x57e   : > { %1683 = vrot.lane.b32.xlu0 %v1678_v22, %s5238_s7  ;;  %1681 = vrot.lane.b32.xlu1 %v1677_v27, %s5238_s7 }
 0x582   : > { %2008 = vrot.lane.b32.xlu1 %v3892_v28, %s5237_s29  ;;  %2012 = vrot.lane.b32.xlu0 %v3892_v28, %s5238_s7 }
 0x5e3   : > { %v1046_v32 = vpop.permute.xlu0 %1045 }
 0x5e4   : > { %v1056_v33 = vsel %vm493_vm13, %v1046_v32, 0.0  ;;  %v1044_v35 = vpop.permute.xlu1 %1043 }
 0x5e5   : > { %v1055_v37 = vsel %vm493_vm13, %v1044_v35, 0.0  ;;  %v1060_v40 = vmax.f32 %v1036_v6, %v1056_v33 }
 0x5e6   : > { %v1059_v38 = vmax.f32 %v1035_v7, %v1055_v37 }
 0x5e8   : > { %v1048_v42 = vpop.permute.xlu0 %1047  ;;  %4405 = vmatprep.mubr.msk.f32.mxu0 %vm642_vm4, %v1059_v38  ;;  %v5164_v43 = vpop.permute.xlu1 %5163 }
 0x5e9   : > { %v1057_v45 = vsel %vm493_vm13, %v1048_v42, 0.0  ;;  %v5166_v47 = vunpack.i.h.bf16 %v5164_v43  ;;  %v5165_v48 = vunpack.i.l.bf16 %v5164_v43  ;;  %4406 = vmatmul.mubr.msk.f32.vlgmr.msra.gmra.mrb[12].mxu0 %vm642_vm4, %v1060_v40 }
 0x5ea   : > { %v1061_v49 = vmax.f32 %v1037_v18, %v1057_v45 }
 0x5eb   : > { %v4873_v50 = vpack.c.bf16 %v5166_v47, %v5165_v48 }
 0x5ec   : > { %v5169_v51 = vpop.permute.xlu0 %5168  ;;  %4408 = vmatprep.mubr.msk.f32.mxu0 %vm642_vm4, %v1061_v49  ;;  %v1050_v52 = vpop.permute.xlu1 %1049 }
 0x5ed   : > { %v5171_v54 = vunpack.i.h.bf16 %v5169_v51  ;;  %v5170_v44 = vunpack.i.l.bf16 %v5169_v51  ;;  %v1058_v55 = vsel %vm493_vm13, %v1050_v52, 0.0  ;;  %4875 = vmatprep.subr.msk.bf16.mxu0 %vm5441_vm12, %v4873_v50 }
 0x5ee   : > { %v1062_v57 = vmax.f32 %v1038_v19, %v1058_v55  ;;  %4878 = vmatpush3.bf16.msk.msra.mxu0 %vm5441_vm12, %v4873_v50 }
 0x5ef   : > { %4880 = vmatprep.subr.bf16.mxu0 %v5649_v1  ;;  %v4883_v61 = vpack.c.bf16 %v5171_v54, %v5170_v44  ;;  %v3928_v54 = vld [vmem:[%s5292_s26 + $0x14] sm:$0xf] }
 0x5f0   : > { %v1684_v59 = vpop.permute.xlu0 %1683  ;;  %4409 = vmatmul.mubr.msk.f32.gmra.mrb[14].mxu0 %vm642_vm4, %v1062_v57  ;;  %v1682_v60 = vpop.permute.xlu1 %1681 }
 0x5f1   : > { %v1688_v62 = vsel %vm280_vm2, %v1684_v59, 0.0  ;;  %v1687_v63 = vsel %vm280_vm2, %v1682_v60, 0.0  ;;  %4449 = vmatprep.mubr.msk.f32.mxu0 %vm516_vm8, %v5417_v56 }
 0x5f2   : > { %v1690_v3 = vmax.f32 %v1678_v22, %v1688_v62  ;;  %v1689_v4 = vmax.f32 %v1677_v27, %v1687_v63  ;;  %4882 = vmatpush3.bf16.msra.mxu0 %v5649_v1 }
 0x5f3   : > { %4885 = vmatprep.subr.msk.bf16.mxu0 %vm5451_vm15, %v4883_v61 }
 0x5f4   : > { %4492 = vmatprep.mubr.msk.f32.mxu1 %vm395_vm7, %v1689_v4  ;;  %v2009_v5 = vpop.permute.xlu1 %2008  ;;  %v2013_v6 = vpop.permute.xlu0 %2012 }
 0x5f5   : > { %v2011_v7 = vsel %vm275_vm1, 0.0, %v2009_v5  ;;  %v2015_v9 = vsel %vm280_vm2, %v2013_v6, 0.0  ;;  %4493 = vmatmul.mubr.msk.f32.vlgmr.msra.gmra.mrb[14].mxu1 %vm395_vm7, %v1690_v3 }
 0x5f6   : > { %v2018_v10 = vsel %vm284_vm3, %v2011_v7, %v2016_v2  ;;  %4888 = vmatpush3.bf16.msk.msra.mxu0 %vm5451_vm15, %v4883_v61  ;;  %4531 = vmatprep.mubr.msk.f32.mxu1 %vm296_vm0, %v5284_v0 }
 0x5f7   : > { %v4943_v1 = vpack.c.bf16 %v2015_v9, %v2018_v10  ;;  %4890 = vmatprep.subr.msk.bf16.mxu0 %vm5322_vm10, %v5240_v24 }
 0x5f9   : > { %4450 = vmatmul.mubr.msk.f32.vlgmr.msra.gmra.mrb[16].mxu0 %vm516_vm8, %v5466_v34  ;;  %4945 = vmatprep.subr.msk.bf16.mxu1 %vm5307_vm5, %v4943_v1 }
 0x5fa   : > { %4948 = vmatpush3.bf16.msk.msra.mxu1 %vm5307_vm5, %v4943_v1  ;;  %4452 = vmatprep.mubr.msk.f32.mxu0 %vm516_vm8, %v5473_v36 }
 0x5fb   : > { %4892 = vmatpush3.bf16.msk.msra.mxu0 %vm5322_vm10, %v5240_v24  ;;  %4950 = vmatprep.subr.msk.bf16.mxu1 %vm5322_vm10, %v5240_v24 }
 0x5fc   : > { %4894 = vmatprep.subr.msk.bf16.mxu0 %vm5329_vm11, %v5240_v24 }
 0x5fd   : > { %4453 = vmatmul.mubr.msk.f32.gmra.mrb[18].mxu0 %vm516_vm8, %v5488_v39  ;;  %4532 = vmatmul.mubr.msk.f32.vlgmr.msra.gmra.mrb[16].mxu1 %vm296_vm0, %v5318_v13 }
 0x5fe   : > { %4952 = vmatpush3.bf16.msk.msra.mxu1 %vm5322_vm10, %v5240_v24 }
 0x5ff   : > { %4896 = vmatpush3.bf16.msk.msra.mxu0 %vm5329_vm11, %v5240_v24  ;;  %4954 = vmatprep.subr.msk.bf16.mxu1 %vm5329_vm11, %v5240_v24 }
 0x602   : > { %4956 = vmatpush3.bf16.msk.msra.mxu1 %vm5329_vm11, %v5240_v24 }
 0x603   : > { %4958 = vmatprep.subr.msk.bf16.mxu1 %vm5339_vm14, %v5240_v24 }
 0x606   : > { %4960 = vmatpush3.bf16.msk.msra.mxu1 %vm5339_vm14, %v5240_v24 }
 0x607   : > { %4962 = vmatprep.subr.msk.bf16.mxu1 %vm5352_vm6, %v5240_v24 }
 0x60a   : > { %4964 = vmatpush3.bf16.msk.msra.mxu1 %vm5352_vm6, %v5240_v24 }
 0x6bc   : > { %v4407_v12 = vpop.f32.mrb[12].mxu0 }
 0x6bd   : > { %3817 = vst.msk [vmem:[%s5639_s9 + $0x28] sm:$0xff] %vm740_vm9, %v4407_v12  ;;  %v1141_v14 = vpop.f32.mrb[13].mxu0 }
 0x6be   : > { %3816 = vst.msk [vmem:[%s5639_s9 + $0x20] sm:$0xff] %vm740_vm9, %v1141_v14 }
 0x6c3   : > { %v4410_v16 = vpop.f32.mrb[14].mxu0 }
 0x6c4   : > { %3819 = vst.msk [vmem:[%s5639_s9 + $0x38] sm:$0xff] %vm740_vm9, %v4410_v16  ;;  %v1151_v17 = vpop.f32.mrb[15].mxu0 }
 0x6c5   : > { %3818 = vst.msk [vmem:[%s5639_s9 + $0x30] sm:$0xff] %vm740_vm9, %v1151_v17 }
 0x6c8   : > { %v4494_v18 = vpop.f32.mrb[14].mxu1 }
 0x6c9   : > { %v1763_v19 = vpop.f32.mrb[15].mxu1 }
 0x6ca   : > { %v5177_v20 = vpack.i.bf16 %v4494_v18, %v1763_v19  ;;  %v5753_v21 = vpack.c.bf16 %v4494_v18, %v1763_v19 }
 0x6cc   : > { %v4451_v22 = vpop.f32.mrb[16].mxu0 }
 0x6cd   : > { %v1442_v27 = vadd.f32 %v4451_v22, %v5531_v41  ;;  %v1436_v28 = vpop.f32.mrb[17].mxu0  ;;  %v2436_v22 = vrot.slane %v3928_v54, 4 }
 0x6ce   : > { %v1437_v32 = vadd.f32 %v1436_v28, %v5535_v46 }
 0x6cf   : > { %v1456_v33 = vmax.f32 %v1442_v27, 0.0 }
 0x6d0   : > { %v1455_v35 = vmax.f32 %v1437_v32, 0.0  ;;  %v4454_v37 = vpop.f32.mrb[18].mxu0  ;;  %v4533_v38 = vpop.f32.mrb[16].mxu1 }
 0x6d1   : > { %v2088_v40 = vpop.f32.mrb[17].mxu1  ;;  %1465 = vrot.lane.b32.xlu0 %v1456_v33, %s5238_s7  ;;  %v1446_v42 = vpop.f32.mrb[19].mxu0  ;;  %v1452_v45 = vadd.f32 %v4454_v37, %v5544_v58  ;;  %v2094_v49 = vadd.f32 %v4533_v38, %v5364_v31 }
 0x6d2   : > { %v1447_v43 = vadd.f32 %v1446_v42, %v5539_v53  ;;  %1463 = vrot.lane.b32.xlu1 %v1455_v35, %s5238_s7  ;;  %v2089_v50 = vadd.f32 %v2088_v40, %v5359_v30 }
 0x6d3   : > { %v1458_v48 = vmax.f32 %v1452_v45, 0.0  ;;  %v2098_v51 = vmax.f32 %v2094_v49, 0.0 }
 0x6d4   : > { %v1457_v47 = vmax.f32 %v1447_v43, 0.0  ;;  %v2097_v52 = vmax.f32 %v2089_v50, 0.0 }
 0x6d6   : > { %1467 = vrot.lane.b32.xlu0 %v1457_v47, %s5238_s7  ;;  %5173 = vrot.lane.b32.xlu1 %v5177_v20, %s5237_s29 }
 0x6da   : > { %5178 = vrot.lane.b32.xlu0 %v5177_v20, %s5238_s7  ;;  %1469 = vrot.lane.b32.xlu1 %v1458_v48, %s5238_s7 }
 0x6de   : > { %2103 = vrot.lane.b32.xlu0 %v2098_v51, %s5238_s7  ;;  %2101 = vrot.lane.b32.xlu1 %v2097_v52, %s5238_s7 }
 0x6e2   : > { %2428 = vrot.lane.b32.xlu1 %v3928_v54, %s5237_s29  ;;  %2432 = vrot.lane.b32.xlu0 %v3928_v54, %s5238_s7 }
 0x743   : > { %v1466_v44 = vpop.permute.xlu0 %1465 }
 0x744   : > { %v1476_v55 = vsel %vm493_vm13, %v1466_v44, 0.0  ;;  %v1464_v57 = vpop.permute.xlu1 %1463 }
 0x745   : > { %v1475_v59 = vsel %vm493_vm13, %v1464_v57, 0.0  ;;  %v1480_v61 = vmax.f32 %v1456_v33, %v1476_v55 }
 0x746   : > { %v1479_v60 = vmax.f32 %v1455_v35, %v1475_v59 }
 0x748   : > { %v1468_v62 = vpop.permute.xlu0 %1467  ;;  %4463 = vmatprep.mubr.msk.f32.mxu0 %vm642_vm4, %v1479_v60  ;;  %v5174_v63 = vpop.permute.xlu1 %5173 }
 0x749   : > { %v1477_v2 = vsel %vm493_vm13, %v1468_v62, 0.0  ;;  %v5176_v3 = vunpack.i.h.bf16 %v5174_v63  ;;  %v5175_v4 = vunpack.i.l.bf16 %v5174_v63  ;;  %4464 = vmatmul.mubr.msk.f32.vlgmr.msra.gmra.mrb[20].mxu0 %vm642_vm4, %v1480_v61 }
 0x74a   : > { %v1481_v5 = vmax.f32 %v1457_v47, %v1477_v2 }
 0x74b   : > { %v4919_v6 = vpack.c.bf16 %v5176_v3, %v5175_v4 }
 0x74c   : > { %v5179_v7 = vpop.permute.xlu0 %5178  ;;  %4466 = vmatprep.mubr.msk.f32.mxu0 %vm642_vm4, %v1481_v5  ;;  %v1470_v9 = vpop.permute.xlu1 %1469 }
 0x74d   : > { %v5181_v10 = vunpack.i.h.bf16 %v5179_v7  ;;  %v5180_v1 = vunpack.i.l.bf16 %v5179_v7  ;;  %v1478_v12 = vsel %vm493_vm13, %v1470_v9, 0.0  ;;  %4921 = vmatprep.subr.msk.bf16.mxu0 %vm5441_vm12, %v4919_v6  ;;  %v3964_v7 = vld [vmem:[%s5292_s26 + $0x18] sm:$0xf] }
 0x74e   : > { %v1482_v14 = vmax.f32 %v1458_v48, %v1478_v12  ;;  %4924 = vmatpush3.bf16.msk.msra.mxu0 %vm5441_vm12, %v4919_v6 }
 0x74f   : > { %4926 = vmatprep.subr.bf16.mxu0 %v5753_v21  ;;  %v4929_v18 = vpack.c.bf16 %v5181_v10, %v5180_v1 }
 0x750   : > { %v2104_v16 = vpop.permute.xlu0 %2103  ;;  %4467 = vmatmul.mubr.msk.f32.gmra.mrb[22].mxu0 %vm642_vm4, %v1482_v14  ;;  %v2102_v17 = vpop.permute.xlu1 %2101 }
 0x751   : > { %v2108_v19 = vsel %vm280_vm2, %v2104_v16, 0.0  ;;  %v2107_v20 = vsel %vm280_vm2, %v2102_v17, 0.0  ;;  %4507 = vmatprep.mubr.msk.f32.mxu0 %vm516_vm8, %v5417_v56 }
 0x752   : > { %v2110_v27 = vmax.f32 %v2098_v51, %v2108_v19  ;;  %v2109_v28 = vmax.f32 %v2097_v52, %v2107_v20  ;;  %4928 = vmatpush3.bf16.msra.mxu0 %v5753_v21 }
 0x753   : > { %4931 = vmatprep.subr.msk.bf16.mxu0 %vm5451_vm15, %v4929_v18 }
 0x754   : > { %4550 = vmatprep.mubr.msk.f32.mxu1 %vm395_vm7, %v2109_v28  ;;  %v2429_v32 = vpop.permute.xlu1 %2428  ;;  %v2433_v33 = vpop.permute.xlu0 %2432 }
 0x755   : > { %v2431_v35 = vsel %vm275_vm1, 0.0, %v2429_v32  ;;  %v2435_v37 = vsel %vm280_vm2, %v2433_v33, 0.0  ;;  %4551 = vmatmul.mubr.msk.f32.vlgmr.msra.gmra.mrb[18].mxu1 %vm395_vm7, %v2110_v27 }
 0x756   : > { %v2438_v38 = vsel %vm284_vm3, %v2431_v35, %v2436_v22  ;;  %4934 = vmatpush3.bf16.msk.msra.mxu0 %vm5451_vm15, %v4929_v18  ;;  %4589 = vmatprep.mubr.msk.f32.mxu1 %vm296_vm0, %v5284_v0 }
 0x757   : > { %v4989_v21 = vpack.c.bf16 %v2435_v37, %v2438_v38  ;;  %4936 = vmatprep.subr.msk.bf16.mxu0 %vm5322_vm10, %v5240_v24 }
 0x759   : > { %4508 = vmatmul.mubr.msk.f32.vlgmr.msra.gmra.mrb[24].mxu0 %vm516_vm8, %v5466_v34  ;;  %4991 = vmatprep.subr.msk.bf16.mxu1 %vm5307_vm5, %v4989_v21 }
 0x75a   : > { %4994 = vmatpush3.bf16.msk.msra.mxu1 %vm5307_vm5, %v4989_v21  ;;  %4510 = vmatprep.mubr.msk.f32.mxu0 %vm516_vm8, %v5473_v36 }
 0x75b   : > { %4938 = vmatpush3.bf16.msk.msra.mxu0 %vm5322_vm10, %v5240_v24  ;;  %4996 = vmatprep.subr.msk.bf16.mxu1 %vm5322_vm10, %v5240_v24 }
 0x75c   : > { %4940 = vmatprep.subr.msk.bf16.mxu0 %vm5329_vm11, %v5240_v24 }
 0x75d   : > { %4511 = vmatmul.mubr.msk.f32.gmra.mrb[26].mxu0 %vm516_vm8, %v5488_v39  ;;  %4590 = vmatmul.mubr.msk.f32.vlgmr.msra.gmra.mrb[20].mxu1 %vm296_vm0, %v5318_v13 }
 0x75e   : > { %4998 = vmatpush3.bf16.msk.msra.mxu1 %vm5322_vm10, %v5240_v24 }
 0x75f   : > { %4942 = vmatpush3.bf16.msk.msra.mxu0 %vm5329_vm11, %v5240_v24  ;;  %5000 = vmatprep.subr.msk.bf16.mxu1 %vm5329_vm11, %v5240_v24 }
 0x762   : > { %5002 = vmatpush3.bf16.msk.msra.mxu1 %vm5329_vm11, %v5240_v24 }
 0x763   : > { %5004 = vmatprep.subr.msk.bf16.mxu1 %vm5339_vm14, %v5240_v24 }
 0x766   : > { %5006 = vmatpush3.bf16.msk.msra.mxu1 %vm5339_vm14, %v5240_v24 }
 0x767   : > { %5008 = vmatprep.subr.msk.bf16.mxu1 %vm5352_vm6, %v5240_v24 }
 0x76a   : > { %5010 = vmatpush3.bf16.msk.msra.mxu1 %vm5352_vm6, %v5240_v24 }
 0x81c   : > { %v4465_v0 = vpop.f32.mrb[20].mxu0 }
 0x81d   : > { %3853 = vst.msk [vmem:[%s5639_s9 + $0x48] sm:$0xff] %vm740_vm9, %v4465_v0  ;;  %v1561_v13 = vpop.f32.mrb[21].mxu0 }
 0x81e   : > { %3852 = vst.msk [vmem:[%s5639_s9 + $0x40] sm:$0xff] %vm740_vm9, %v1561_v13 }
 0x823   : > { %v4468_v40 = vpop.f32.mrb[22].mxu0 }
 0x824   : > { %3855 = vst.msk [vmem:[%s5639_s9 + $0x58] sm:$0xff] %vm740_vm9, %v4468_v40  ;;  %v1571_v42 = vpop.f32.mrb[23].mxu0 }
 0x825   : > { %3854 = vst.msk [vmem:[%s5639_s9 + $0x50] sm:$0xff] %vm740_vm9, %v1571_v42 }
 0x828   : > { %v4552_v43 = vpop.f32.mrb[18].mxu1 }
 0x829   : > { %v2183_v45 = vpop.f32.mrb[19].mxu1 }
 0x82a   : > { %v5187_v47 = vpack.i.bf16 %v4552_v43, %v2183_v45  ;;  %v5857_v48 = vpack.c.bf16 %v4552_v43, %v2183_v45  ;;  %v2856_v45 = vrot.slane %v3964_v7, 4 }
 0x82c   : > { %v4509_v49 = vpop.f32.mrb[24].mxu0 }
 0x82d   : > { %v1862_v50 = vadd.f32 %v4509_v49, %v5531_v41  ;;  %v1856_v51 = vpop.f32.mrb[25].mxu0 }
 0x82e   : > { %v1857_v52 = vadd.f32 %v1856_v51, %v5535_v46 }
 0x82f   : > { %v1876_v54 = vmax.f32 %v1862_v50, 0.0 }
 0x830   : > { %v1875_v44 = vmax.f32 %v1857_v52, 0.0  ;;  %v4512_v55 = vpop.f32.mrb[26].mxu0  ;;  %v4591_v57 = vpop.f32.mrb[20].mxu1 }
 0x831   : > { %v2508_v59 = vpop.f32.mrb[21].mxu1  ;;  %1885 = vrot.lane.b32.xlu0 %v1876_v54, %s5238_s7  ;;  %v1866_v60 = vpop.f32.mrb[27].mxu0  ;;  %v1872_v62 = vadd.f32 %v4512_v55, %v5544_v58  ;;  %v2514_v3 = vadd.f32 %v4591_v57, %v5364_v31 }
 0x832   : > { %v1867_v61 = vadd.f32 %v1866_v60, %v5539_v53  ;;  %1883 = vrot.lane.b32.xlu1 %v1875_v44, %s5238_s7  ;;  %v2509_v4 = vadd.f32 %v2508_v59, %v5359_v30 }
 0x833   : > { %v1878_v2 = vmax.f32 %v1872_v62, 0.0  ;;  %v2518_v5 = vmax.f32 %v2514_v3, 0.0 }
 0x834   : > { %v1877_v63 = vmax.f32 %v1867_v61, 0.0  ;;  %v2517_v6 = vmax.f32 %v2509_v4, 0.0 }
 0x836   : > { %1887 = vrot.lane.b32.xlu0 %v1877_v63, %s5238_s7  ;;  %5183 = vrot.lane.b32.xlu1 %v5187_v47, %s5237_s29 }
 0x83a   : > { %5188 = vrot.lane.b32.xlu0 %v5187_v47, %s5238_s7  ;;  %1889 = vrot.lane.b32.xlu1 %v1878_v2, %s5238_s7 }
 0x83e   : > { %2523 = vrot.lane.b32.xlu0 %v2518_v5, %s5238_s7  ;;  %2521 = vrot.lane.b32.xlu1 %v2517_v6, %s5238_s7 }
 0x842   : > { %2848 = vrot.lane.b32.xlu1 %v3964_v7, %s5237_s29  ;;  %2852 = vrot.lane.b32.xlu0 %v3964_v7, %s5238_s7 }
 0x8a3   : > { %v1886_v9 = vpop.permute.xlu0 %1885 }
 0x8a4   : > { %v1896_v10 = vsel %vm493_vm13, %v1886_v9, 0.0  ;;  %v1884_v1 = vpop.permute.xlu1 %1883 }
 0x8a5   : > { %v1895_v12 = vsel %vm493_vm13, %v1884_v1, 0.0  ;;  %v1900_v16 = vmax.f32 %v1876_v54, %v1896_v10 }
 0x8a6   : > { %v1899_v14 = vmax.f32 %v1875_v44, %v1895_v12 }
 0x8a8   : > { %v1888_v17 = vpop.permute.xlu0 %1887  ;;  %4521 = vmatprep.mubr.msk.f32.mxu0 %vm642_vm4, %v1899_v14  ;;  %v5184_v18 = vpop.permute.xlu1 %5183 }
 0x8a9   : > { %v1897_v19 = vsel %vm493_vm13, %v1888_v17, 0.0  ;;  %v5186_v20 = vunpack.i.h.bf16 %v5184_v18  ;;  %v5185_v22 = vunpack.i.l.bf16 %v5184_v18  ;;  %4522 = vmatmul.mubr.msk.f32.vlgmr.msra.gmra.mrb[28].mxu0 %vm642_vm4, %v1900_v16 }
 0x8aa   : > { %v1901_v27 = vmax.f32 %v1877_v63, %v1897_v19 }
 0x8ab   : > { %v4965_v28 = vpack.c.bf16 %v5186_v20, %v5185_v22 }
 0x8ac   : > { %v5189_v32 = vpop.permute.xlu0 %5188  ;;  %4524 = vmatprep.mubr.msk.f32.mxu0 %vm642_vm4, %v1901_v27  ;;  %v1890_v33 = vpop.permute.xlu1 %1889  ;;  %v4000_v27 = vld [vmem:[%s5292_s26 + $0x1c] sm:$0xf] }
 0x8ad   : > { %v5191_v35 = vunpack.i.h.bf16 %v5189_v32  ;;  %v5190_v37 = vunpack.i.l.bf16 %v5189_v32  ;;  %v1898_v38 = vsel %vm493_vm13, %v1890_v33, 0.0  ;;  %4967 = vmatprep.subr.msk.bf16.mxu0 %vm5441_vm12, %v4965_v28 }
 0x8ae   : > { %v1902_v21 = vmax.f32 %v1878_v2, %v1898_v38  ;;  %4970 = vmatpush3.bf16.msk.msra.mxu0 %vm5441_vm12, %v4965_v28 }
 0x8af   : > { %4972 = vmatprep.subr.bf16.mxu0 %v5857_v48  ;;  %v4975_v40 = vpack.c.bf16 %v5191_v35, %v5190_v37 }
 0x8b0   : > { %v2524_v0 = vpop.permute.xlu0 %2523  ;;  %4525 = vmatmul.mubr.msk.f32.gmra.mrb[30].mxu0 %vm642_vm4, %v1902_v21  ;;  %v2522_v13 = vpop.permute.xlu1 %2521 }
 0x8b1   : > { %v2528_v42 = vsel %vm280_vm2, %v2524_v0, 0.0  ;;  %v2527_v43 = vsel %vm280_vm2, %v2522_v13, 0.0  ;;  %4565 = vmatprep.mubr.msk.f32.mxu0 %vm516_vm8, %v5417_v56 }
 0x8b2   : > { %v2530_v47 = vmax.f32 %v2518_v5, %v2528_v42  ;;  %v2529_v49 = vmax.f32 %v2517_v6, %v2527_v43  ;;  %4974 = vmatpush3.bf16.msra.mxu0 %v5857_v48  ;;  %v5906_v48 = vld [vmem:[%s6239_s1] sm:$0xff] }
 0x8b3   : > { %4977 = vmatprep.subr.msk.bf16.mxu0 %vm5451_vm15, %v4975_v40 }
 0x8b4   : > { %4608 = vmatprep.mubr.msk.f32.mxu1 %vm395_vm7, %v2529_v49  ;;  %v2849_v50 = vpop.permute.xlu1 %2848  ;;  %v2853_v51 = vpop.permute.xlu0 %2852 }
 0x8b5   : > { %v2851_v52 = vsel %vm275_vm1, 0.0, %v2849_v50  ;;  %v2855_v54 = vsel %vm280_vm2, %v2853_v51, 0.0  ;;  %4609 = vmatmul.mubr.msk.f32.vlgmr.msra.gmra.mrb[22].mxu1 %vm395_vm7, %v2530_v47 }
 0x8b6   : > { %v2858_v56 = vsel %vm284_vm3, %v2851_v52, %v2856_v45  ;;  %4980 = vmatpush3.bf16.msk.msra.mxu0 %vm5451_vm15, %v4975_v40  ;;  %4647 = vmatprep.mubr.msk.f32.mxu1 %vm296_vm0, %v5906_v48 }
 0x8b7   : > { %v5035_v44 = vpack.c.bf16 %v2855_v54, %v2858_v56  ;;  %4982 = vmatprep.subr.msk.bf16.mxu0 %vm5322_vm10, %v5240_v24 }
 0x8b9   : > { %4566 = vmatmul.mubr.msk.f32.vlgmr.msra.gmra.mrb[32].mxu0 %vm516_vm8, %v5466_v34  ;;  %5037 = vmatprep.subr.msk.bf16.mxu1 %vm5307_vm5, %v5035_v44  ;;  %v5935_v34 = vld [vmem:[%s6239_s1 + $0x8] sm:$0xff] }
 0x8ba   : > { %5040 = vmatpush3.bf16.msk.msra.mxu1 %vm5307_vm5, %v5035_v44  ;;  %4568 = vmatprep.mubr.msk.f32.mxu0 %vm516_vm8, %v5473_v36 }
 0x8bb   : > { %4984 = vmatpush3.bf16.msk.msra.mxu0 %vm5322_vm10, %v5240_v24  ;;  %5042 = vmatprep.subr.msk.bf16.mxu1 %vm5322_vm10, %v5240_v24 }
 0x8bc   : > { %4986 = vmatprep.subr.msk.bf16.mxu0 %vm5329_vm11, %v5240_v24 }
 0x8bd   : > { %4569 = vmatmul.mubr.msk.f32.gmra.mrb[34].mxu0 %vm516_vm8, %v5488_v39  ;;  %4648 = vmatmul.mubr.msk.f32.vlgmr.msra.gmra.mrb[24].mxu1 %vm296_vm0, %v5935_v34 }
 0x8be   : > { %5044 = vmatpush3.bf16.msk.msra.mxu1 %vm5322_vm10, %v5240_v24 }
 0x8bf   : > { %4988 = vmatpush3.bf16.msk.msra.mxu0 %vm5329_vm11, %v5240_v24  ;;  %5046 = vmatprep.subr.msk.bf16.mxu1 %vm5329_vm11, %v5240_v24 }
 0x8c2   : > { %5048 = vmatpush3.bf16.msk.msra.mxu1 %vm5329_vm11, %v5240_v24 }
 0x8c3   : > { %5050 = vmatprep.subr.msk.bf16.mxu1 %vm5339_vm14, %v5240_v24 }
 0x8c6   : > { %5052 = vmatpush3.bf16.msk.msra.mxu1 %vm5339_vm14, %v5240_v24 }
 0x8c7   : > { %5054 = vmatprep.subr.msk.bf16.mxu1 %vm5352_vm6, %v5240_v24 }
 0x8ca   : > { %5056 = vmatpush3.bf16.msk.msra.mxu1 %vm5352_vm6, %v5240_v24 }
 0x97c   : > { %v4523_v36 = vpop.f32.mrb[28].mxu0 }
 0x97d   : > { %3889 = vst.msk [vmem:[%s5639_s9 + $0x68] sm:$0xff] %vm740_vm9, %v4523_v36  ;;  %v1981_v39 = vpop.f32.mrb[29].mxu0 }
 0x97e   : > { %3888 = vst.msk [vmem:[%s5639_s9 + $0x60] sm:$0xff] %vm740_vm9, %v1981_v39 }
 0x983   : > { %v4526_v55 = vpop.f32.mrb[30].mxu0 }
 0x984   : > { %3891 = vst.msk [vmem:[%s5639_s9 + $0x78] sm:$0xff] %vm740_vm9, %v4526_v55  ;;  %v1991_v57 = vpop.f32.mrb[31].mxu0 }
 0x985   : > { %3890 = vst.msk [vmem:[%s5639_s9 + $0x70] sm:$0xff] %vm740_vm9, %v1991_v57  ;;  %v6008_v57 = vld [vmem:[%s6241_s3] sm:$0xff] }
 0x988   : > { %v4610_v59 = vpop.f32.mrb[22].mxu1 }
 0x989   : > { %v2603_v60 = vpop.f32.mrb[23].mxu1 }
 0x98a   : > { %v5197_v61 = vpack.i.bf16 %v4610_v59, %v2603_v60  ;;  %v5971_v62 = vpack.c.bf16 %v4610_v59, %v2603_v60  ;;  %v3276_v59 = vrot.slane %v4000_v27, 4 }
 0x98c   : > { %v4567_v63 = vpop.f32.mrb[32].mxu0 }
 0x98d   : > { %v2282_v2 = vadd.f32 %v4567_v63, %v5531_v41  ;;  %v2276_v3 = vpop.f32.mrb[33].mxu0 }
 0x98e   : > { %v2277_v4 = vadd.f32 %v2276_v3, %v5535_v46 }
 0x98f   : > { %v2296_v5 = vmax.f32 %v2282_v2, 0.0 }
 0x990   : > { %v2295_v6 = vmax.f32 %v2277_v4, 0.0  ;;  %v4570_v7 = vpop.f32.mrb[34].mxu0  ;;  %v4649_v9 = vpop.f32.mrb[24].mxu1 }
 0x991   : > { %v2928_v10 = vpop.f32.mrb[25].mxu1  ;;  %2305 = vrot.lane.b32.xlu0 %v2296_v5, %s5238_s7  ;;  %v2286_v1 = vpop.f32.mrb[35].mxu0  ;;  %v2292_v14 = vadd.f32 %v4570_v7, %v5544_v58  ;;  %v2934_v18 = vadd.f32 %v4649_v9, %v5364_v31 }
 0x992   : > { %v2287_v12 = vadd.f32 %v2286_v1, %v5539_v53  ;;  %2303 = vrot.lane.b32.xlu1 %v2295_v6, %s5238_s7  ;;  %v2929_v19 = vadd.f32 %v2928_v10, %v5359_v30 }
 0x993   : > { %v2298_v17 = vmax.f32 %v2292_v14, 0.0  ;;  %v2938_v20 = vmax.f32 %v2934_v18, 0.0 }
 0x994   : > { %v2297_v16 = vmax.f32 %v2287_v12, 0.0  ;;  %v2937_v22 = vmax.f32 %v2929_v19, 0.0 }
 0x996   : > { %2307 = vrot.lane.b32.xlu0 %v2297_v16, %s5238_s7  ;;  %5193 = vrot.lane.b32.xlu1 %v5197_v61, %s5237_s29 }
 0x99a   : > { %5198 = vrot.lane.b32.xlu0 %v5197_v61, %s5238_s7  ;;  %2309 = vrot.lane.b32.xlu1 %v2298_v17, %s5238_s7 }
 0x99e   : > { %2943 = vrot.lane.b32.xlu0 %v2938_v20, %s5238_s7  ;;  %2941 = vrot.lane.b32.xlu1 %v2937_v22, %s5238_s7 }
 0x9a2   : > { %3268 = vrot.lane.b32.xlu1 %v4000_v27, %s5237_s29  ;;  %3272 = vrot.lane.b32.xlu0 %v4000_v27, %s5238_s7 }
 0xa03   : > { %v2306_v28 = vpop.permute.xlu0 %2305 }
 0xa04   : > { %v2316_v32 = vsel %vm493_vm13, %v2306_v28, 0.0  ;;  %v2304_v33 = vpop.permute.xlu1 %2303 }
 0xa05   : > { %v2315_v35 = vsel %vm493_vm13, %v2304_v33, 0.0  ;;  %v2320_v38 = vmax.f32 %v2296_v5, %v2316_v32 }
 0xa06   : > { %v2319_v37 = vmax.f32 %v2295_v6, %v2315_v35  ;;  %v6030_v6 = vld [vmem:[%s6241_s3 + $0x8] sm:$0xff] }
 0xa08   : > { %v2308_v21 = vpop.permute.xlu0 %2307  ;;  %4579 = vmatprep.mubr.msk.f32.mxu0 %vm642_vm4, %v2319_v37  ;;  %v5194_v0 = vpop.permute.xlu1 %5193 }
 0xa09   : > { %v2317_v13 = vsel %vm493_vm13, %v2308_v21, 0.0  ;;  %v5196_v40 = vunpack.i.h.bf16 %v5194_v0  ;;  %v5195_v42 = vunpack.i.l.bf16 %v5194_v0  ;;  %4580 = vmatmul.mubr.msk.f32.vlgmr.msra.gmra.mrb[36].mxu0 %vm642_vm4, %v2320_v38 }
 0xa0a   : > { %v2321_v43 = vmax.f32 %v2297_v16, %v2317_v13 }
 0xa0b   : > { %v5011_v45 = vpack.c.bf16 %v5196_v40, %v5195_v42 }
 0xa0c   : > { %v5199_v47 = vpop.permute.xlu0 %5198  ;;  %4582 = vmatprep.mubr.msk.f32.mxu0 %vm642_vm4, %v2321_v43  ;;  %v2310_v49 = vpop.permute.xlu1 %2309 }
 0xa0d   : > { %v5201_v50 = vunpack.i.h.bf16 %v5199_v47  ;;  %v5200_v51 = vunpack.i.l.bf16 %v5199_v47  ;;  %v2318_v52 = vsel %vm493_vm13, %v2310_v49, 0.0  ;;  %5013 = vmatprep.subr.msk.bf16.mxu0 %vm5441_vm12, %v5011_v45 }
 0xa0e   : > { %v2322_v54 = vmax.f32 %v2298_v17, %v2318_v52  ;;  %5016 = vmatpush3.bf16.msk.msra.mxu0 %vm5441_vm12, %v5011_v45 }
 0xa0f   : > { %5018 = vmatprep.subr.bf16.mxu0 %v5971_v62  ;;  %v5021_v36 = vpack.c.bf16 %v5201_v50, %v5200_v51 }
 0xa10   : > { %v2944_v56 = vpop.permute.xlu0 %2943  ;;  %4583 = vmatmul.mubr.msk.f32.gmra.mrb[38].mxu0 %vm642_vm4, %v2322_v54  ;;  %v2942_v44 = vpop.permute.xlu1 %2941 }
 0xa11   : > { %v2948_v39 = vsel %vm280_vm2, %v2944_v56, 0.0  ;;  %v2947_v55 = vsel %vm280_vm2, %v2942_v44, 0.0  ;;  %4623 = vmatprep.mubr.msk.f32.mxu0 %vm516_vm8, %v6008_v57 }
 0xa12   : > { %v2950_v60 = vmax.f32 %v2938_v20, %v2948_v39  ;;  %v2949_v61 = vmax.f32 %v2937_v22, %v2947_v55  ;;  %5020 = vmatpush3.bf16.msra.mxu0 %v5971_v62 }
 0xa13   : > { %5023 = vmatprep.subr.msk.bf16.mxu0 %vm5451_vm15, %v5021_v36 }
 0xa14   : > { %4666 = vmatprep.mubr.msk.f32.mxu1 %vm395_vm7, %v2949_v61  ;;  %v3269_v63 = vpop.permute.xlu1 %3268  ;;  %v3273_v2 = vpop.permute.xlu0 %3272 }
 0xa15   : > { %v3271_v3 = vsel %vm275_vm1, 0.0, %v3269_v63  ;;  %v3275_v4 = vsel %vm280_vm2, %v3273_v2, 0.0  ;;  %4667 = vmatmul.mubr.msk.f32.vlgmr.msra.gmra.mrb[26].mxu1 %vm395_vm7, %v2950_v60 }
 0xa16   : > { %v3278_v5 = vsel %vm284_vm3, %v3271_v3, %v3276_v59  ;;  %5026 = vmatpush3.bf16.msk.msra.mxu0 %vm5451_vm15, %v5021_v36  ;;  %4705 = vmatprep.mubr.msk.f32.mxu1 %vm296_vm0, %v5906_v48  ;;  %v6041_v48 = vld [vmem:[%s6241_s3 + $0x10] sm:$0xff] }
 0xa17   : > { %v5081_v62 = vpack.c.bf16 %v3275_v4, %v3278_v5  ;;  %5028 = vmatprep.subr.msk.bf16.mxu0 %vm5322_vm10, %v5240_v24 }
 0xa19   : > { %4624 = vmatmul.mubr.msk.f32.vlgmr.msra.gmra.mrb[40].mxu0 %vm516_vm8, %v6030_v6  ;;  %5083 = vmatprep.subr.msk.bf16.mxu1 %vm5307_vm5, %v5081_v62 }
 0xa1a   : > { %5086 = vmatpush3.bf16.msk.msra.mxu1 %vm5307_vm5, %v5081_v62  ;;  %4626 = vmatprep.mubr.msk.f32.mxu0 %vm516_vm8, %v6041_v48 }
 0xa1b   : > { %5030 = vmatpush3.bf16.msk.msra.mxu0 %vm5322_vm10, %v5240_v24  ;;  %5088 = vmatprep.subr.msk.bf16.mxu1 %vm5322_vm10, %v5240_v24 }
 0xa1c   : > { %5032 = vmatprep.subr.msk.bf16.mxu0 %vm5329_vm11, %v5240_v24 }
 0xa1d   : > { %4627 = vmatmul.mubr.msk.f32.gmra.mrb[42].mxu0 %vm516_vm8, %v6057_v11  ;;  %4706 = vmatmul.mubr.msk.f32.vlgmr.msra.gmra.mrb[28].mxu1 %vm296_vm0, %v5935_v34 }
 0xa1e   : > { %5090 = vmatpush3.bf16.msk.msra.mxu1 %vm5322_vm10, %v5240_v24 }
 0xa1f   : > { %5034 = vmatpush3.bf16.msk.msra.mxu0 %vm5329_vm11, %v5240_v24  ;;  %5092 = vmatprep.subr.msk.bf16.mxu1 %vm5329_vm11, %v5240_v24 }
 0xa22   : > { %5094 = vmatpush3.bf16.msk.msra.mxu1 %vm5329_vm11, %v5240_v24 }
 0xa23   : > { %5096 = vmatprep.subr.msk.bf16.mxu1 %vm5339_vm14, %v5240_v24 }
 0xa26   : > { %5098 = vmatpush3.bf16.msk.msra.mxu1 %vm5339_vm14, %v5240_v24 }
 0xa27   : > { %5100 = vmatprep.subr.msk.bf16.mxu1 %vm5352_vm6, %v5240_v24 }
 0xa2a   : > { %5102 = vmatpush3.bf16.msk.msra.mxu1 %vm5352_vm6, %v5240_v24 }
 0xadc   : > { %v4581_v34 = vpop.f32.mrb[36].mxu0 }
 0xadd   : > { %3925 = vst.msk [vmem:[%s5639_s9 + $0x88] sm:$0xff] %vm740_vm9, %v4581_v34  ;;  %v2401_v7 = vpop.f32.mrb[37].mxu0 }
 0xade   : > { %3924 = vst.msk [vmem:[%s5639_s9 + $0x80] sm:$0xff] %vm740_vm9, %v2401_v7 }
 0xae3   : > { %v4584_v9 = vpop.f32.mrb[38].mxu0 }
 0xae4   : > { %3927 = vst.msk [vmem:[%s5639_s9 + $0x98] sm:$0xff] %vm740_vm9, %v4584_v9  ;;  %v2411_v10 = vpop.f32.mrb[39].mxu0 }
 0xae5   : > { %3926 = vst.msk [vmem:[%s5639_s9 + $0x90] sm:$0xff] %vm740_vm9, %v2411_v10 }
 0xae8   : > { %v4668_v26 = vpop.f32.mrb[26].mxu1 }
 0xae9   : > { %v3023_v1 = vpop.f32.mrb[27].mxu1 }
 0xaea   : > { %v5207_v12 = vpack.i.bf16 %v4668_v26, %v3023_v1  ;;  %v5063_v14 = vpack.c.bf16 %v4668_v26, %v3023_v1 }
 0xaec   : > { %v4625_v16 = vpop.f32.mrb[40].mxu0 }
 0xaed   : > { %v2702_v29 = vadd.f32 %v4625_v16, %v5531_v41  ;;  %v2696_v17 = vpop.f32.mrb[41].mxu0 }
 0xaee   : > { %v2697_v18 = vadd.f32 %v2696_v17, %v5535_v46 }
 0xaef   : > { %v2716_v19 = vmax.f32 %v2702_v29, 0.0 }
 0xaf0   : > { %v2715_v20 = vmax.f32 %v2697_v18, 0.0  ;;  %v4628_v22 = vpop.f32.mrb[42].mxu0  ;;  %v4707_v27 = vpop.f32.mrb[28].mxu1 }
 0xaf1   : > { %v3348_v28 = vpop.f32.mrb[29].mxu1  ;;  %2725 = vrot.lane.b32.xlu0 %v2716_v19, %s5238_s7  ;;  %v2706_v32 = vpop.f32.mrb[43].mxu0  ;;  %v2712_v35 = vadd.f32 %v4628_v22, %v5544_v58  ;;  %v3354_v21 = vadd.f32 %v4707_v27, %v5364_v31 }
 0xaf2   : > { %v2707_v33 = vadd.f32 %v2706_v32, %v5539_v53  ;;  %2723 = vrot.lane.b32.xlu1 %v2715_v20, %s5238_s7  ;;  %v3349_v0 = vadd.f32 %v3348_v28, %v5359_v30 }
 0xaf3   : > { %v2718_v38 = vmax.f32 %v2712_v35, 0.0  ;;  %v3358_v13 = vmax.f32 %v3354_v21, 0.0 }
 0xaf4   : > { %v2717_v37 = vmax.f32 %v2707_v33, 0.0  ;;  %v3357_v40 = vmax.f32 %v3349_v0, 0.0 }
 0xaf6   : > { %2727 = vrot.lane.b32.xlu0 %v2717_v37, %s5238_s7  ;;  %5203 = vrot.lane.b32.xlu1 %v5207_v12, %s5237_s29 }
 0xafa   : > { %5208 = vrot.lane.b32.xlu0 %v5207_v12, %s5238_s7  ;;  %2729 = vrot.lane.b32.xlu1 %v2718_v38, %s5238_s7 }
 0xafe   : > { %3363 = vrot.lane.b32.xlu0 %v3358_v13, %s5238_s7  ;;  %3361 = vrot.lane.b32.xlu1 %v3357_v40, %s5238_s7 }
 0xb63   : > { %v2726_v42 = vpop.permute.xlu0 %2725 }
 0xb64   : > { %v2736_v43 = vsel %vm493_vm13, %v2726_v42, 0.0  ;;  %v2724_v45 = vpop.permute.xlu1 %2723 }
 0xb65   : > { %v2735_v47 = vsel %vm493_vm13, %v2724_v45, 0.0  ;;  %v2740_v31 = vmax.f32 %v2716_v19, %v2736_v43 }
 0xb66   : > { %v2739_v49 = vmax.f32 %v2715_v20, %v2735_v47 }
 0xb68   : > { %v2728_v50 = vpop.permute.xlu0 %2727  ;;  %4637 = vmatprep.mubr.msk.f32.mxu0 %vm642_vm4, %v2739_v49  ;;  %v5204_v30 = vpop.permute.xlu1 %5203 }
 0xb69   : > { %v2737_v51 = vsel %vm493_vm13, %v2728_v50, 0.0  ;;  %v5206_v52 = vunpack.i.h.bf16 %v5204_v30  ;;  %v5205_v54 = vunpack.i.l.bf16 %v5204_v30  ;;  %4638 = vmatmul.mubr.msk.f32.vlgmr.msra.gmra.mrb[44].mxu0 %vm642_vm4, %v2740_v31 }
 0xb6a   : > { %v2741_v56 = vmax.f32 %v2717_v37, %v2737_v51 }
 0xb6b   : > { %v5057_v44 = vpack.c.bf16 %v5206_v52, %v5205_v54 }
 0xb6c   : > { %v5209_v36 = vpop.permute.xlu0 %5208  ;;  %4640 = vmatprep.mubr.msk.f32.mxu0 %vm642_vm4, %v2741_v56  ;;  %v2730_v39 = vpop.permute.xlu1 %2729 }
 0xb6d   : > { %v5211_v55 = vunpack.i.h.bf16 %v5209_v36  ;;  %v5210_v59 = vunpack.i.l.bf16 %v5209_v36  ;;  %v2738_v60 = vsel %vm493_vm13, %v2730_v39, 0.0  ;;  %5059 = vmatprep.subr.msk.bf16.mxu0 %vm5441_vm12, %v5057_v44 }
 0xb6e   : > { %v2742_v61 = vmax.f32 %v2718_v38, %v2738_v60  ;;  %5062 = vmatpush3.bf16.msk.msra.mxu0 %vm5441_vm12, %v5057_v44 }
 0xb6f   : > { %5064 = vmatprep.subr.bf16.mxu0 %v5063_v14  ;;  %v5067_v3 = vpack.c.bf16 %v5211_v55, %v5210_v59 }
 0xb70   : > { %v3364_v63 = vpop.permute.xlu0 %3363  ;;  %4641 = vmatmul.mubr.msk.f32.gmra.mrb[46].mxu0 %vm642_vm4, %v2742_v61  ;;  %v3362_v2 = vpop.permute.xlu1 %3361 }
 0xb71   : > { %v3368_v4 = vsel %vm280_vm2, %v3364_v63, 0.0  ;;  %v3367_v5 = vsel %vm280_vm2, %v3362_v2, 0.0  ;;  %4681 = vmatprep.mubr.msk.f32.mxu0 %vm516_vm8, %v6008_v57 }
 0xb72   : > { %v3370_v62 = vmax.f32 %v3358_v13, %v3368_v4  ;;  %v3369_v34 = vmax.f32 %v3357_v40, %v3367_v5  ;;  %5066 = vmatpush3.bf16.msra.mxu0 %v5063_v14 }
 0xb73   : > { %5069 = vmatprep.subr.msk.bf16.mxu0 %vm5451_vm15, %v5067_v3 }
 0xb74   : > { %4724 = vmatprep.mubr.msk.f32.mxu1 %vm395_vm7, %v3369_v34 }
 0xb75   : > { %4725 = vmatmul.mubr.msk.f32.vlgmr.msra.gmra.mrb[30].mxu1 %vm395_vm7, %v3370_v62 }
 0xb76   : > { %5072 = vmatpush3.bf16.msk.msra.mxu0 %vm5451_vm15, %v5067_v3 }
 0xb77   : > { %5074 = vmatprep.subr.msk.bf16.mxu0 %vm5322_vm10, %v5240_v24 }
 0xb79   : > { %4682 = vmatmul.mubr.msk.f32.vlgmr.msra.gmra.mrb[48].mxu0 %vm516_vm8, %v6030_v6 }
 0xb7a   : > { %4684 = vmatprep.mubr.msk.f32.mxu0 %vm516_vm8, %v6041_v48  ;;  %5076 = vmatpush3.bf16.msk.msra.mxu0 %vm5322_vm10, %v5240_v24 }
 0xb7b   : > { %5078 = vmatprep.subr.msk.bf16.mxu0 %vm5329_vm11, %v5240_v24 }
 0xb7d   : > { %4685 = vmatmul.mubr.msk.f32.gmra.mrb[50].mxu0 %vm516_vm8, %v6057_v11 }
 0xb7e   : > { %5080 = vmatpush3.bf16.msk.msra.mxu0 %vm5329_vm11, %v5240_v24 }
 0xc3c   : > { %v4639_v7 = vpop.f32.mrb[44].mxu0 }
 0xc3d   : > { %3961 = vst.msk [vmem:[%s5639_s9 + $0xa8] sm:$0xff] %vm740_vm9, %v4639_v7  ;;  %v2821_v9 = vpop.f32.mrb[45].mxu0 }
 0xc3e   : > { %3960 = vst.msk [vmem:[%s5639_s9 + $0xa0] sm:$0xff] %vm740_vm9, %v2821_v9 }
 0xc43   : > { %v4642_v10 = vpop.f32.mrb[46].mxu0 }
 0xc44   : > { %3963 = vst.msk [vmem:[%s5639_s9 + $0xb8] sm:$0xff] %vm740_vm9, %v4642_v10  ;;  %v2831_v26 = vpop.f32.mrb[47].mxu0 }
 0xc45   : > { %3962 = vst.msk [vmem:[%s5639_s9 + $0xb0] sm:$0xff] %vm740_vm9, %v2831_v26 }
 0xc48   : > { %v4726_v1 = vpop.f32.mrb[30].mxu1 }
 0xc49   : > { %v3443_v12 = vpop.f32.mrb[31].mxu1 }
 0xc4a   : > { %v5217_v14 = vpack.i.bf16 %v4726_v1, %v3443_v12  ;;  %v5109_v16 = vpack.c.bf16 %v4726_v1, %v3443_v12 }
 0xc4c   : > { %v4683_v29 = vpop.f32.mrb[48].mxu0 }
 0xc4d   : > { %v3122_v17 = vadd.f32 %v4683_v29, %v5531_v41  ;;  %v3116_v18 = vpop.f32.mrb[49].mxu0 }
 0xc4e   : > { %v3117_v19 = vadd.f32 %v3116_v18, %v5535_v46 }
 0xc4f   : > { %v3136_v20 = vmax.f32 %v3122_v17, 0.0 }
 0xc50   : > { %v3135_v22 = vmax.f32 %v3117_v19, 0.0  ;;  %v4686_v27 = vpop.f32.mrb[50].mxu0 }
 0xc51   : > { %3145 = vrot.lane.b32.xlu0 %v3136_v20, %s5238_s7  ;;  %v3126_v28 = vpop.f32.mrb[51].mxu0  ;;  %v3132_v33 = vadd.f32 %v4686_v27, %v5544_v58 }
 0xc52   : > { %v3127_v32 = vadd.f32 %v3126_v28, %v5539_v53  ;;  %3143 = vrot.lane.b32.xlu1 %v3135_v22, %s5238_s7 }
 0xc53   : > { %v3138_v37 = vmax.f32 %v3132_v33, 0.0 }
 0xc54   : > { %v3137_v35 = vmax.f32 %v3127_v32, 0.0 }
 0xc56   : > { %3147 = vrot.lane.b32.xlu0 %v3137_v35, %s5238_s7  ;;  %5213 = vrot.lane.b32.xlu1 %v5217_v14, %s5237_s29 }
 0xc5a   : > { %5218 = vrot.lane.b32.xlu0 %v5217_v14, %s5238_s7  ;;  %3149 = vrot.lane.b32.xlu1 %v3138_v37, %s5238_s7 }
 0xcc3   : > { %v3146_v38 = vpop.permute.xlu0 %3145 }
 0xcc4   : > { %v3156_v21 = vsel %vm493_vm13, %v3146_v38, 0.0  ;;  %v3144_v0 = vpop.permute.xlu1 %3143 }
 0xcc5   : > { %v3155_v13 = vsel %vm493_vm13, %v3144_v0, 0.0  ;;  %v3160_v42 = vmax.f32 %v3136_v20, %v3156_v21 }
 0xcc6   : > { %v3159_v40 = vmax.f32 %v3135_v22, %v3155_v13 }
 0xcc8   : > { %v3148_v43 = vpop.permute.xlu0 %3147  ;;  %4695 = vmatprep.mubr.msk.f32.mxu0 %vm642_vm4, %v3159_v40  ;;  %v5214_v45 = vpop.permute.xlu1 %5213 }
 0xcc9   : > { %v3157_v47 = vsel %vm493_vm13, %v3148_v43, 0.0  ;;  %v5216_v49 = vunpack.i.h.bf16 %v5214_v45  ;;  %v5215_v31 = vunpack.i.l.bf16 %v5214_v45  ;;  %4696 = vmatmul.mubr.msk.f32.vlgmr.msra.gmra.mrb[52].mxu0 %vm642_vm4, %v3160_v42 }
 0xcca   : > { %v3161_v50 = vmax.f32 %v3137_v35, %v3157_v47 }
 0xccb   : > { %v5103_v30 = vpack.c.bf16 %v5216_v49, %v5215_v31 }
 0xccc   : > { %v5219_v51 = vpop.permute.xlu0 %5218  ;;  %4698 = vmatprep.mubr.msk.f32.mxu0 %vm642_vm4, %v3161_v50  ;;  %v3150_v52 = vpop.permute.xlu1 %3149 }
 0xccd   : > { %v5221_v54 = vunpack.i.h.bf16 %v5219_v51  ;;  %v5220_v56 = vunpack.i.l.bf16 %v5219_v51  ;;  %v3158_v44 = vsel %vm493_vm13, %v3150_v52, 0.0  ;;  %5105 = vmatprep.subr.msk.bf16.mxu0 %vm5441_vm12, %v5103_v30 }
 0xcce   : > { %v3162_v36 = vmax.f32 %v3138_v37, %v3158_v44  ;;  %5108 = vmatpush3.bf16.msk.msra.mxu0 %vm5441_vm12, %v5103_v30 }
 0xccf   : > { %5110 = vmatprep.subr.bf16.mxu0 %v5109_v16  ;;  %v5113_v39 = vpack.c.bf16 %v5221_v54, %v5220_v56 }
 0xcd0   : > { %4699 = vmatmul.mubr.msk.f32.gmra.mrb[54].mxu0 %vm642_vm4, %v3162_v36 }
 0xcd1   : > { %4739 = vmatprep.mubr.msk.f32.mxu0 %vm516_vm8, %v6008_v57 }
 0xcd2   : > { %5112 = vmatpush3.bf16.msra.mxu0 %v5109_v16 }
 0xcd3   : > { %5115 = vmatprep.subr.msk.bf16.mxu0 %vm5451_vm15, %v5113_v39 }
 0xcd6   : > { %5118 = vmatpush3.bf16.msk.msra.mxu0 %vm5451_vm15, %v5113_v39 }
 0xcd7   : > { %5120 = vmatprep.subr.msk.bf16.mxu0 %vm5322_vm10, %v5240_v24 }
 0xcd9   : > { %4740 = vmatmul.mubr.msk.f32.vlgmr.msra.gmra.mrb[56].mxu0 %vm516_vm8, %v6030_v6 }
 0xcda   : > { %4742 = vmatprep.mubr.msk.f32.mxu0 %vm516_vm8, %v6041_v48  ;;  %5122 = vmatpush3.bf16.msk.msra.mxu0 %vm5322_vm10, %v5240_v24 }
 0xcdb   : > { %5124 = vmatprep.subr.msk.bf16.mxu0 %vm5329_vm11, %v5240_v24 }
 0xcdd   : > { %4743 = vmatmul.mubr.msk.f32.gmra.mrb[58].mxu0 %vm516_vm8, %v6057_v11 }
 0xcde   : > { %5126 = vmatpush3.bf16.msk.msra.mxu0 %vm5329_vm11, %v5240_v24 }
 0xd9c   : > { %v4697_v8 = vpop.f32.mrb[52].mxu0 }
 0xd9d   : > { %3997 = vst.msk [vmem:[%s5639_s9 + $0xc8] sm:$0xff] %vm740_vm9, %v4697_v8  ;;  %v3241_v15 = vpop.f32.mrb[53].mxu0 }
 0xd9e   : > { %3996 = vst.msk [vmem:[%s5639_s9 + $0xc0] sm:$0xff] %vm740_vm9, %v3241_v15 }
 0xda3   : > { %v4700_v57 = vpop.f32.mrb[54].mxu0 }
 0xda4   : > { %3999 = vst.msk [vmem:[%s5639_s9 + $0xd8] sm:$0xff] %vm740_vm9, %v4700_v57  ;;  %v3251_v23 = vpop.f32.mrb[55].mxu0 }
 0xda5   : > { %3998 = vst.msk [vmem:[%s5639_s9 + $0xd0] sm:$0xff] %vm740_vm9, %v3251_v23 }
 0xdac   : > { %v4741_v6 = vpop.f32.mrb[56].mxu0 }
 0xdad   : > { %v3542_v48 = vadd.f32 %v4741_v6, %v5531_v41  ;;  %v3536_v11 = vpop.f32.mrb[57].mxu0 }
 0xdae   : > { %v3537_v55 = vadd.f32 %v3536_v11, %v5535_v46 }
 0xdaf   : > { %v3556_v25 = vmax.f32 %v3542_v48, 0.0 }
 0xdb0   : > { %v3555_v24 = vmax.f32 %v3537_v55, 0.0  ;;  %v4744_v59 = vpop.f32.mrb[58].mxu0 }
 0xdb1   : > { %v3552_v60 = vadd.f32 %v4744_v59, %v5544_v58  ;;  %3565 = vrot.lane.b32.xlu0 %v3556_v25, %s5238_s7  ;;  %v3546_v61 = vpop.f32.mrb[59].mxu0 }
 0xdb2   : > { %v3547_v63 = vadd.f32 %v3546_v61, %v5539_v53  ;;  %3563 = vrot.lane.b32.xlu1 %v3555_v24, %s5238_s7 }
 0xdb3   : > { %v3558_v2 = vmax.f32 %v3552_v60, 0.0 }
 0xdb4   : > { %v3557_v3 = vmax.f32 %v3547_v63, 0.0 }
 0xdb5   : > { %3569 = vrot.lane.b32.xlu0 %v3558_v2, %s5238_s7 }
 0xdb6   : > { %3567 = vrot.lane.b32.xlu1 %v3557_v3, %s5238_s7 }
 0xe23   : > { %v3566_v41 = vpop.permute.xlu0 %3565 }
 0xe24   : > { %v3576_v46 = vsel %vm493_vm13, %v3566_v41, 0.0  ;;  %v3564_v4 = vpop.permute.xlu1 %3563 }
 0xe25   : > { %v3575_v58 = vsel %vm493_vm13, %v3564_v4, 0.0  ;;  %v3580_v62 = vmax.f32 %v3556_v25, %v3576_v46 }
 0xe26   : > { %v3579_v5 = vmax.f32 %v3555_v24, %v3575_v58 }
 0xe27   : > { %v3570_v53 = vpop.permute.xlu0 %3569 }
 0xe28   : > { %v3578_v34 = vsel %vm493_vm13, %v3570_v53, 0.0  ;;  %4753 = vmatprep.mubr.msk.f32.mxu0 %vm642_vm4, %v3579_v5  ;;  %v3568_v7 = vpop.permute.xlu1 %3567 }
 0xe29   : > { %v3577_v9 = vsel %vm493_vm13, %v3568_v7, 0.0  ;;  %4754 = vmatmul.mubr.msk.f32.vlgmr.msra.gmra.mrb[60].mxu0 %vm642_vm4, %v3580_v62  ;;  %v3582_v26 = vmax.f32 %v3558_v2, %v3578_v34 }
 0xe2a   : > { %v3581_v10 = vmax.f32 %v3557_v3, %v3577_v9 }
 0xe2c   : > { %4756 = vmatprep.mubr.msk.f32.mxu0 %vm642_vm4, %v3581_v10 }
 0xe2d   : > { %4757 = vmatmul.mubr.msk.f32.gmra.mrb[62].mxu0 %vm642_vm4, %v3582_v26 }
 0xefc   : > { %v4755_v1 = vpop.f32.mrb[60].mxu0 }
 0xefd   : > { %4033 = vst.msk [vmem:[%s5639_s9 + $0xe8] sm:$0xff] %vm740_vm9, %v4755_v1  ;;  %v3661_v12 = vpop.f32.mrb[61].mxu0 }
 0xefe   : > { %4032 = vst.msk [vmem:[%s5639_s9 + $0xe0] sm:$0xff] %vm740_vm9, %v3661_v12 }
 0xf00   : > { %v4758_v14 = vpop.f32.mrb[62].mxu0 }
 0xf01   : > { %4035 = vst.msk [vmem:[%s5639_s9 + $0xf8] sm:$0xff] %vm740_vm9, %v4758_v14  ;;  %v3671_v16 = vpop.f32.mrb[63].mxu0 }
 0xf02   : > { %4034 = vst.msk [vmem:[%s5639_s9 + $0xf0] sm:$0xff] %vm740_vm9, %v3671_v16 }
 0xf03 PF: > { %s15_s18 = sadd.s32 1, %s5234_s18  }
 0xf04   : > { %p12_p4 = scmp.ge.s32.totalorder %s15_s18, 4  }
 0xf06   :  { %14 = sbr.rel (!%p12_p4) target bundleno = 1 (0x1), region = 84 }

</bundles_post_ra>
